<compile_context>
chip_gen: v6e
topology: v6e:2x2x1
jax: 0.10.0
libtpu: 0.0.40
codegen_flags: <defaults>
</compile_context>

<pallas_src>
import jax
import jax.numpy as jnp
from jax import lax
from jax.experimental import pallas as pl
from jax.experimental.pallas import tpu as pltpu

BN_EPS = 1e-5
LANE = 128
_VMEM_LIMIT = 32 * 1024 * 1024


# --------------------------------------------------------------------------
# small helpers (layout glue only)
# --------------------------------------------------------------------------
def _round_up(n, m):
    return ((n + m - 1) // m) * m


def _pick_row_tile(per_image_rows, cap=1024):
    """Largest multiple-of-8 tile <= cap that divides the per-image row count."""
    for t in (cap, 512, 256, 128, 64, 32, 16, 8):
        if t <= per_image_rows and per_image_rows % t == 0:
            return t
    return per_image_rows


def _pad_last(a, width):
    pad = width - a.shape[-1]
    if pad == 0:
        return a
    return jnp.pad(a, [(0, 0)] * (a.ndim - 1) + [(0, pad)])


def _im2col(x_nhwc, ksize, stride, pad):
    """(B,H,W,C) -> (B*Ho*Wo, ksize*ksize*C), taps folded into the K axis
    (tap-major, channel-minor) so a whole conv becomes ONE matmul."""
    b, h, w, c = x_nhwc.shape
    ho = (h + 2 * pad - ksize) // stride + 1
    wo = (w + 2 * pad - ksize) // stride + 1
    xp = jnp.pad(x_nhwc, ((0, 0), (pad, pad), (pad, pad), (0, 0)))
    cols = []
    for ky in range(ksize):
        for kx in range(ksize):
            cols.append(xp[:, ky:ky + stride * (ho - 1) + 1:stride,
                           kx:kx + stride * (wo - 1) + 1:stride, :])
    patches = jnp.concatenate(cols, axis=-1)            # (B, Ho, Wo, K*K*C)
    return patches.reshape(b * ho * wo, ksize * ksize * c)


def _compiler_params():
    return pltpu.CompilerParams(dimension_semantics=("parallel",),
                                vmem_limit_bytes=_VMEM_LIMIT)


# --------------------------------------------------------------------------
# Pallas kernels
# --------------------------------------------------------------------------
def _conv_relu_stats_kernel(p_ref, w_ref, b_ref, y_ref, st_ref):
    """One row tile of  y = ReLU(patches @ W + b)  plus per-tile BN partials."""
    acc = jnp.dot(p_ref[...], w_ref[...], preferred_element_type=jnp.float32)
    y = jnp.maximum(acc + b_ref[...], 0.0)
    yb = y.astype(y_ref.dtype)
    y_ref[...] = yb
    yf = yb.astype(jnp.float32)          # stats on the stored (rounded) values
    s = jnp.sum(yf, axis=0, keepdims=True)
    ss = jnp.sum(yf * yf, axis=0, keepdims=True)
    st_ref[...] = jnp.concatenate([s, ss], axis=0)[None]


def _affine_kernel(y_ref, sc_ref, sh_ref, h_ref):
    """h = y * scale + shift  (BN affine; shift may include the time embedding)."""
    h = y_ref[...].astype(jnp.float32) * sc_ref[...] + sh_ref[0]
    h_ref[...] = h.astype(h_ref.dtype)


def _conv_bias_kernel(p_ref, w_ref, b_ref, o_ref):
    acc = jnp.dot(p_ref[...], w_ref[...], preferred_element_type=jnp.float32)
    o_ref[...] = (acc + b_ref[...]).astype(o_ref.dtype)


def _time_mlp_kernel(t_ref, wt_ref, bt_ref, o_ref):
    acc = jnp.dot(t_ref[...], wt_ref[...], preferred_element_type=jnp.float32)
    o_ref[...] = jnp.maximum(acc + bt_ref[...], 0.0)


# --------------------------------------------------------------------------
# gridded stages
# --------------------------------------------------------------------------
def _conv_relu_bn_stats(x_nhwc, w_hwio, bias, gamma, beta, cp, tile):
    """3x3/pad-1 conv -> ReLU over row tiles.  Returns the pre-BN activation
    (rows, cp) bf16 and the folded BN scale/shift (1, cp) f32."""
    b, h, w, _ = x_nhwc.shape
    rows = b * h * w
    patches = _im2col(x_nhwc, 3, 1, 1).astype(jnp.bfloat16)     # (rows, 9*Cin)
    kdim = patches.shape[1]
    cout = w_hwio.shape[-1]
    wflat = _pad_last(w_hwio.reshape(-1, cout), cp).astype(jnp.bfloat16)
    bvec = _pad_last(bias.astype(jnp.float32)[None, :], cp)
    ntiles = rows // tile

    y, stats = pl.pallas_call(
        _conv_relu_stats_kernel,
        grid=(ntiles,),
        in_specs=[pl.BlockSpec((tile, kdim), lambda i: (i, 0)),
                  pl.BlockSpec((kdim, cp), lambda i: (0, 0)),    # resident weights
                  pl.BlockSpec((1, cp), lambda i: (0, 0))],      # resident bias
        out_specs=(pl.BlockSpec((tile, cp), lambda i: (i, 0)),
                   pl.BlockSpec((1, 2, cp), lambda i: (i, 0, 0))),
        out_shape=(jax.ShapeDtypeStruct((rows, cp), jnp.bfloat16),
                   jax.ShapeDtypeStruct((ntiles, 2, cp), jnp.float32)),
        compiler_params=_compiler_params(),
    )(patches, wflat, bvec)

    # Tiny cross-tile reduction + fold of training-mode BN into a per-channel affine.
    total = jnp.sum(stats, axis=0)                               # (2, cp) f32
    mean = total[0] / rows
    var = jnp.maximum(total[1] / rows - mean * mean, 0.0)        # biased variance
    scale = _pad_last(gamma.astype(jnp.float32)[None, :], cp) * lax.rsqrt(var[None, :] + BN_EPS)
    shift = _pad_last(beta.astype(jnp.float32)[None, :], cp) - mean[None, :] * scale
    return y, scale, shift


def _apply_affine(y, scale, shift_rows, tile):
    """h = y * scale + shift, gridded over row tiles.
    shift_rows: (nb, 1, cp) with nb == 1 (shared) or nb == B (per batch);
    rows are batch-major and `tile` divides the per-batch row count."""
    rows, cp = y.shape
    nb = shift_rows.shape[0]
    rows_per_b = rows // nb
    ntiles = rows // tile
    reps = rows_per_b // tile
    shift_tiled = jnp.repeat(shift_rows, reps, axis=0)           # (ntiles, 1, cp)
    return pl.pallas_call(
        _affine_kernel,
        grid=(ntiles,),
        in_specs=[pl.BlockSpec((tile, cp), lambda i: (i, 0)),
                  pl.BlockSpec((1, cp), lambda i: (0, 0)),
                  pl.BlockSpec((1, 1, cp), lambda i: (i, 0, 0))],
        out_specs=pl.BlockSpec((tile, cp), lambda i: (i, 0)),
        out_shape=jax.ShapeDtypeStruct((rows, cp), jnp.bfloat16),
        compiler_params=_compiler_params(),
    )(y, scale, shift_tiled)


def _strided_conv(x_nhwc, w_hwio, bias, cp, tile):
    """4x4 / stride-2 / pad-1 conv (the `transform` layer), gridded."""
    b, h, w, _ = x_nhwc.shape
    ho = (h + 2 - 4) // 2 + 1
    wo = (w + 2 - 4) // 2 + 1
    rows = b * ho * wo
    patches = _im2col(x_nhwc, 4, 2, 1).astype(jnp.bfloat16)      # (rows, 16*C)
    kdim = patches.shape[1]
    cout = w_hwio.shape[-1]
    wflat = _pad_last(w_hwio.reshape(-1, cout), cp).astype(jnp.bfloat16)
    bvec = _pad_last(bias.astype(jnp.float32)[None, :], cp)
    ntiles = rows // tile
    out = pl.pallas_call(
        _conv_bias_kernel,
        grid=(ntiles,),
        in_specs=[pl.BlockSpec((tile, kdim), lambda i: (i, 0)),
                  pl.BlockSpec((kdim, cp), lambda i: (0, 0)),
                  pl.BlockSpec((1, cp), lambda i: (0, 0))],
        out_specs=pl.BlockSpec((tile, cp), lambda i: (i, 0)),
        out_shape=jax.ShapeDtypeStruct((rows, cp), jnp.float32),
        compiler_params=_compiler_params(),
    )(patches, wflat, bvec)
    return out, ho, wo


def _time_mlp(t, wt, bt, cp):
    b = t.shape[0]
    wtp = _pad_last(wt.astype(jnp.float32), cp)
    btp = _pad_last(bt.astype(jnp.float32)[None, :], cp)
    return pl.pallas_call(
        _time_mlp_kernel,
        out_shape=jax.ShapeDtypeStruct((b, cp), jnp.float32),
        in_specs=[pl.BlockSpec(memory_space=pltpu.MemorySpace.VMEM) for _ in range(3)],
        out_specs=pl.BlockSpec(memory_space=pltpu.MemorySpace.VMEM),
    )(t.astype(jnp.float32), wtp, btp)


# --------------------------------------------------------------------------
# full forward (PyTorch-facing NCHW in / NCHW out)
# --------------------------------------------------------------------------
def block_forward(x_nchw, t, params):
    (w1, b1, g1, be1, wt, bt, w2, b2, g2, be2, w3, b3) = params
    b, _, h, w = x_nchw.shape
    cout = w1.shape[-1]
    cp = _round_up(cout, LANE)
    tile = _pick_row_tile(h * w)

    x = jnp.transpose(x_nchw, (0, 2, 3, 1)).astype(jnp.bfloat16)   # NCHW -> NHWC

    # --- conv1 -> ReLU (+ BN1 partials), then BN1 affine + time embedding ----
    y1, scale1, shift1 = _conv_relu_bn_stats(x, w1, b1, g1, be1, cp, tile)
    temb = _time_mlp(t, wt, bt, cp)                                # (B, cp)
    shift1b = (shift1 + temb)[:, None, :]                          # (B, 1, cp)
    h1 = _apply_affine(y1, scale1, shift1b, tile)                  # (B*H*W, cp) bf16
    h1_nhwc = h1[:, :cout].reshape(b, h, w, cout)

    # --- conv2 -> ReLU (+ BN2 partials), then BN2 affine ---------------------
    y2, scale2, shift2 = _conv_relu_bn_stats(h1_nhwc, w2, b2, g2, be2, cp, tile)
    h2 = _apply_affine(y2, scale2, shift2[:, None, :], tile)
    h2_nhwc = h2[:, :cout].reshape(b, h, w, cout)

    # --- transform: 4x4 / stride-2 / pad-1 conv ------------------------------
    tile_o = _pick_row_tile(((h + 2 - 4) // 2 + 1) * ((w + 2 - 4) // 2 + 1))
    out, ho, wo = _strided_conv(h2_nhwc, w3, b3, cp, tile_o)
    out = out[:, :cout].reshape(b, ho, wo, cout)
    return jnp.transpose(out, (0, 3, 1, 2))                        # NHWC -> NCHW


# --------------------------------------------------------------------------
# pure-JAX reference (for correctness check)
# --------------------------------------------------------------------------
def ref_forward(x_nchw, t, params):
    (w1, b1, g1, be1, wt, bt, w2, b2, g2, be2, w3, b3) = params

    def conv(x, w_hwio, bias, stride, pad):
        w_oihw = jnp.transpose(w_hwio, (3, 2, 0, 1))
        y = lax.conv_general_dilated(
            x, w_oihw, (stride, stride), [(pad, pad), (pad, pad)],
            dimension_numbers=('NCHW', 'OIHW', 'NCHW'))
        return y + bias[None, :, None, None]

    def bn(hh, g, bta):
        mu = hh.mean(axis=(0, 2, 3), keepdims=True)
        var = ((hh - mu) ** 2).mean(axis=(0, 2, 3), keepdims=True)
        return ((hh - mu) * lax.rsqrt(var + BN_EPS)
                * g[None, :, None, None] + bta[None, :, None, None])

    hh = bn(jax.nn.relu(conv(x_nchw, w1, b1, 1, 1)), g1, be1)
    te = jax.nn.relu(t @ wt + bt)
    hh = hh + te[:, :, None, None]
    hh = bn(jax.nn.relu(conv(hh, w2, b2, 1, 1)), g2, be2)
    return conv(hh, w3, b3, 2, 1)


# --------------------------------------------------------------------------
if __name__ == "__main__":
    key = jax.random.PRNGKey(0)
    B, in_ch, H, W = 2, 4, 16, 16
    out_ch, t_dim = 8, 32

    ks = jax.random.split(key, 10)
    x = jax.random.normal(ks[0], (B, in_ch, H, W), jnp.float32)
    t = jax.random.normal(ks[1], (B, t_dim), jnp.float32)

    # Deterministic parameter init (shapes follow the module's __init__, up=False)
    w1 = 0.1 * jax.random.normal(ks[2], (3, 3, in_ch, out_ch), jnp.float32)
    b1 = 0.1 * jax.random.normal(ks[3], (out_ch,), jnp.float32)
    wt = 0.1 * jax.random.normal(ks[4], (t_dim, out_ch), jnp.float32)
    bt = 0.1 * jax.random.normal(ks[5], (out_ch,), jnp.float32)
    w2 = 0.1 * jax.random.normal(ks[6], (3, 3, out_ch, out_ch), jnp.float32)
    b2 = 0.1 * jax.random.normal(ks[7], (out_ch,), jnp.float32)
    w3 = 0.1 * jax.random.normal(ks[8], (4, 4, out_ch, out_ch), jnp.float32)
    b3 = 0.1 * jax.random.normal(ks[9], (out_ch,), jnp.float32)
    g1, be1 = jnp.ones((out_ch,), jnp.float32), jnp.zeros((out_ch,), jnp.float32)
    g2, be2 = jnp.ones((out_ch,), jnp.float32), jnp.zeros((out_ch,), jnp.float32)

    params = (w1, b1, g1, be1, wt, bt, w2, b2, g2, be2, w3, b3)

    fwd = jax.jit(block_forward)
    out = jax.block_until_ready(fwd(x, t, params))
    assert out.shape == (B, out_ch, H // 2, W // 2), out.shape

    ref = jax.block_until_ready(ref_forward(x, t, params))
    max_err = float(jnp.max(jnp.abs(out - ref)))
    rel_err = float(jnp.linalg.norm(out - ref) / (jnp.linalg.norm(ref) + 1e-12))
    # bf16 matmul inputs / bf16 intermediate storage => relaxed (but still
    # bug-catching) tolerances relative to the f32 reference.
    assert max_err < 2e-1 and rel_err < 4e-2, (max_err, rel_err)

    print("KERNEL_OK")
</pallas_src>

<mosaic_0001>
module attributes {stable_mosaic.version = 11 : i64} {
  func.func @_conv_relu_stats_kernel(%arg0: i32, %arg1: memref<256x36xbf16, #tpu.memory_space<vmem>>, %arg2: memref<36x128xbf16, #tpu.memory_space<vmem>>, %arg3: memref<1x128xf32, #tpu.memory_space<vmem>>, %arg4: memref<256x128xbf16, #tpu.memory_space<vmem>>, %arg5: memref<1x2x128xf32, #tpu.memory_space<vmem>>) attributes {dimension_semantics = [#tpu.dimension_semantics<parallel>], iteration_bounds = array<i64: 2>, scalar_prefetch = 0 : i64, scratch_operands = 0 : i64, tpu.core_type = #tpu.core_type<tc>, window_params = [{transform_indices = @transform_0, window_bounds = array<i64: 256, 36>}, {pipeline_mode = #tpu.pipeline_mode<synchronous>, transform_indices = @transform_1, window_bounds = array<i64: 36, 128>}, {pipeline_mode = #tpu.pipeline_mode<synchronous>, transform_indices = @transform_2, window_bounds = array<i64: 1, 128>}, {transform_indices = @transform_3, window_bounds = array<i64: 256, 128>}, {transform_indices = @transform_4, window_bounds = array<i64: 1, 2, 128>}]} {
    %c0 = arith.constant 0 : index
    %c0_0 = arith.constant 0 : index
    %0 = vector.load %arg1[%c0, %c0_0] : memref<256x36xbf16, #tpu.memory_space<vmem>>, vector<256x36xbf16>
    %c0_1 = arith.constant 0 : index
    %c0_2 = arith.constant 0 : index
    %1 = vector.load %arg2[%c0_1, %c0_2] : memref<36x128xbf16, #tpu.memory_space<vmem>>, vector<36x128xbf16>
    %cst = arith.constant dense<0.000000e+00> : vector<256x128xf32>
    %2 = tpu.matmul %0, %1, %cst {dimension_numbers = #tpu.dot_dimension_numbers<[1], [0], [0], [1], [0, 0, 1, 1], [], []>} : vector<256x36xbf16>, vector<36x128xbf16>, vector<256x128xf32> -> vector<256x128xf32>
    %c0_3 = arith.constant 0 : index
    %c0_4 = arith.constant 0 : index
    %3 = vector.load %arg3[%c0_3, %c0_4] : memref<1x128xf32, #tpu.memory_space<vmem>>, vector<1x128xf32>
    %4 = vector.broadcast %3 : vector<1x128xf32> to vector<256x128xf32>
    %5 = arith.addf %2, %4 : vector<256x128xf32>
    %cst_5 = arith.constant 0.000000e+00 : f32
    %6 = vector.broadcast %cst_5 : f32 to vector<256x128xf32>
    %7 = arith.maximumf %5, %6 : vector<256x128xf32>
    %8 = arith.truncf %7 : vector<256x128xf32> to vector<256x128xbf16>
    %c0_6 = arith.constant 0 : index
    %c0_7 = arith.constant 0 : index
    %9 = vector.load %arg4[%c0_6, %c0_7] : memref<256x128xbf16, #tpu.memory_space<vmem>>, vector<256x128xbf16>
    tpu.vector_store %arg4[%c0_6, %c0_7], %8 {strides = array<i32>} : memref<256x128xbf16, #tpu.memory_space<vmem>>, vector<256x128xbf16>,
    %10 = arith.extf %8 : vector<256x128xbf16> to vector<256x128xf32>
    %cst_8 = arith.constant dense<0.000000e+00> : vector<128xf32>
    %11 = vector.multi_reduction <add>, %10, %cst_8 [0] : vector<256x128xf32> to vector<128xf32>
    %12 = vector.shape_cast %11 : vector<128xf32> to vector<1x128xf32>
    %13 = arith.mulf %10, %10 : vector<256x128xf32>
    %cst_9 = arith.constant dense<0.000000e+00> : vector<128xf32>
    %14 = vector.multi_reduction <add>, %13, %cst_9 [0] : vector<256x128xf32> to vector<128xf32>
    %15 = vector.shape_cast %14 : vector<128xf32> to vector<1x128xf32>
    %16 = tpu.concatenate %12, %15 in 0 : vector<1x128xf32>, vector<1x128xf32> -> vector<2x128xf32>
    %17 = vector.shape_cast %16 : vector<2x128xf32> to vector<1x2x128xf32>
    %c0_10 = arith.constant 0 : index
    %c0_11 = arith.constant 0 : index
    %c0_12 = arith.constant 0 : index
    %18 = vector.load %arg5[%c0_10, %c0_11, %c0_12] : memref<1x2x128xf32, #tpu.memory_space<vmem>>, vector<1x2x128xf32>
    tpu.vector_store %arg5[%c0_10, %c0_11, %c0_12], %17 {strides = array<i32>} : memref<1x2x128xf32, #tpu.memory_space<vmem>>, vector<1x2x128xf32>,
    return
  }
  func.func @transform_0(%arg0: i32) -> (i32, i32) {
    %c0_i32 = arith.constant 0 : i32
    %c0_i32_0 = arith.constant 0 : i32
    return %arg0, %c0_i32 : i32, i32
  }
  func.func @transform_1(%arg0: i32) -> (i32, i32) {
    %c0_i32 = arith.constant 0 : i32
    %c0_i32_0 = arith.constant 0 : i32
    %c0_i32_1 = arith.constant 0 : i32
    return %c0_i32, %c0_i32_0 : i32, i32
  }
  func.func @transform_2(%arg0: i32) -> (i32, i32) {
    %c0_i32 = arith.constant 0 : i32
    %c0_i32_0 = arith.constant 0 : i32
    %c0_i32_1 = arith.constant 0 : i32
    return %c0_i32, %c0_i32_0 : i32, i32
  }
  func.func @transform_3(%arg0: i32) -> (i32, i32) {
    %c0_i32 = arith.constant 0 : i32
    %c0_i32_0 = arith.constant 0 : i32
    return %arg0, %c0_i32 : i32, i32
  }
  func.func @transform_4(%arg0: i32) -> (i32, i32, i32) {
    %c0_i32 = arith.constant 0 : i32
    %c0_i32_0 = arith.constant 0 : i32
    %c0_i32_1 = arith.constant 0 : i32
    return %arg0, %c0_i32, %c0_i32_0 : i32, i32, i32
  }
}

module attributes {stable_mosaic.version = 11 : i64} {
  func.func @_time_mlp_kernel(%arg0: memref<2x32xf32, #tpu.memory_space<vmem>>, %arg1: memref<32x128xf32, #tpu.memory_space<vmem>>, %arg2: memref<1x128xf32, #tpu.memory_space<vmem>>, %arg3: memref<2x128xf32, #tpu.memory_space<vmem>>) attributes {dimension_semantics = [], scalar_prefetch = 0 : i64, scratch_operands = 0 : i64, tpu.core_type = #tpu.core_type<tc>} {
    %c0 = arith.constant 0 : index
    %c0_0 = arith.constant 0 : index
    %0 = vector.load %arg0[%c0, %c0_0] : memref<2x32xf32, #tpu.memory_space<vmem>>, vector<2x32xf32>
    %c0_1 = arith.constant 0 : index
    %c0_2 = arith.constant 0 : index
    %1 = vector.load %arg1[%c0_1, %c0_2] : memref<32x128xf32, #tpu.memory_space<vmem>>, vector<32x128xf32>
    %cst = arith.constant dense<0.000000e+00> : vector<2x128xf32>
    %2 = tpu.matmul %0, %1, %cst {dimension_numbers = #tpu.dot_dimension_numbers<[1], [0], [0], [1], [0, 0, 1, 1], [], []>} : vector<2x32xf32>, vector<32x128xf32>, vector<2x128xf32> -> vector<2x128xf32>
    %c0_3 = arith.constant 0 : index
    %c0_4 = arith.constant 0 : index
    %3 = vector.load %arg2[%c0_3, %c0_4] : memref<1x128xf32, #tpu.memory_space<vmem>>, vector<1x128xf32>
    %4 = vector.broadcast %3 : vector<1x128xf32> to vector<2x128xf32>
    %5 = arith.addf %2, %4 : vector<2x128xf32>
    %cst_5 = arith.constant 0.000000e+00 : f32
    %6 = vector.broadcast %cst_5 : f32 to vector<2x128xf32>
    %7 = arith.maximumf %5, %6 : vector<2x128xf32>
    %c0_6 = arith.constant 0 : index
    %c0_7 = arith.constant 0 : index
    %8 = vector.load %arg3[%c0_6, %c0_7] : memref<2x128xf32, #tpu.memory_space<vmem>>, vector<2x128xf32>
    tpu.vector_store %arg3[%c0_6, %c0_7], %7 {strides = array<i32>} : memref<2x128xf32, #tpu.memory_space<vmem>>, vector<2x128xf32>,
    return
  }
}

module attributes {stable_mosaic.version = 11 : i64} {
  func.func @_affine_kernel(%arg0: i32, %arg1: memref<256x128xbf16, #tpu.memory_space<vmem>>, %arg2: memref<1x128xf32, #tpu.memory_space<vmem>>, %arg3: memref<1x1x128xf32, #tpu.memory_space<vmem>>, %arg4: memref<256x128xbf16, #tpu.memory_space<vmem>>) attributes {dimension_semantics = [#tpu.dimension_semantics<parallel>], iteration_bounds = array<i64: 2>, scalar_prefetch = 0 : i64, scratch_operands = 0 : i64, tpu.core_type = #tpu.core_type<tc>, window_params = [{transform_indices = @transform_0, window_bounds = array<i64: 256, 128>}, {pipeline_mode = #tpu.pipeline_mode<synchronous>, transform_indices = @transform_1, window_bounds = array<i64: 1, 128>}, {transform_indices = @transform_2, window_bounds = array<i64: 1, 1, 128>}, {transform_indices = @transform_3, window_bounds = array<i64: 256, 128>}]} {
    %c0 = arith.constant 0 : index
    %c0_0 = arith.constant 0 : index
    %0 = vector.load %arg1[%c0, %c0_0] : memref<256x128xbf16, #tpu.memory_space<vmem>>, vector<256x128xbf16>
    %1 = arith.extf %0 : vector<256x128xbf16> to vector<256x128xf32>
    %c0_1 = arith.constant 0 : index
    %c0_2 = arith.constant 0 : index
    %2 = vector.load %arg2[%c0_1, %c0_2] : memref<1x128xf32, #tpu.memory_space<vmem>>, vector<1x128xf32>
    %3 = vector.broadcast %2 : vector<1x128xf32> to vector<256x128xf32>
    %4 = arith.mulf %1, %3 : vector<256x128xf32>
    %c0_3 = arith.constant 0 : index
    %c0_4 = arith.constant 0 : index
    %c0_5 = arith.constant 0 : index
    %5 = vector.load %arg3[%c0_3, %c0_4, %c0_5] : memref<1x1x128xf32, #tpu.memory_space<vmem>>, vector<1x1x128xf32>
    %6 = vector.shape_cast %5 : vector<1x1x128xf32> to vector<1x128xf32>
    %7 = vector.broadcast %6 : vector<1x128xf32> to vector<256x128xf32>
    %8 = arith.addf %4, %7 : vector<256x128xf32>
    %9 = arith.truncf %8 : vector<256x128xf32> to vector<256x128xbf16>
    %c0_6 = arith.constant 0 : index
    %c0_7 = arith.constant 0 : index
    %10 = vector.load %arg4[%c0_6, %c0_7] : memref<256x128xbf16, #tpu.memory_space<vmem>>, vector<256x128xbf16>
    tpu.vector_store %arg4[%c0_6, %c0_7], %9 {strides = array<i32>} : memref<256x128xbf16, #tpu.memory_space<vmem>>, vector<256x128xbf16>,
    return
  }
  func.func @transform_0(%arg0: i32) -> (i32, i32) {
    %c0_i32 = arith.constant 0 : i32
    %c0_i32_0 = arith.constant 0 : i32
    return %arg0, %c0_i32 : i32, i32
  }
  func.func @transform_1(%arg0: i32) -> (i32, i32) {
    %c0_i32 = arith.constant 0 : i32
    %c0_i32_0 = arith.constant 0 : i32
    %c0_i32_1 = arith.constant 0 : i32
    return %c0_i32, %c0_i32_0 : i32, i32
  }
  func.func @transform_2(%arg0: i32) -> (i32, i32, i32) {
    %c0_i32 = arith.constant 0 : i32
    %c0_i32_0 = arith.constant 0 : i32
    %c0_i32_1 = arith.constant 0 : i32
    return %arg0, %c0_i32, %c0_i32_0 : i32, i32, i32
  }
  func.func @transform_3(%arg0: i32) -> (i32, i32) {
    %c0_i32 = arith.constant 0 : i32
    %c0_i32_0 = arith.constant 0 : i32
    return %arg0, %c0_i32 : i32, i32
  }
}

module attributes {stable_mosaic.version = 11 : i64} {
  func.func @_conv_relu_stats_kernel(%arg0: i32, %arg1: memref<256x72xbf16, #tpu.memory_space<vmem>>, %arg2: memref<72x128xbf16, #tpu.memory_space<vmem>>, %arg3: memref<1x128xf32, #tpu.memory_space<vmem>>, %arg4: memref<256x128xbf16, #tpu.memory_space<vmem>>, %arg5: memref<1x2x128xf32, #tpu.memory_space<vmem>>) attributes {dimension_semantics = [#tpu.dimension_semantics<parallel>], iteration_bounds = array<i64: 2>, scalar_prefetch = 0 : i64, scratch_operands = 0 : i64, tpu.core_type = #tpu.core_type<tc>, window_params = [{transform_indices = @transform_0, window_bounds = array<i64: 256, 72>}, {pipeline_mode = #tpu.pipeline_mode<synchronous>, transform_indices = @transform_1, window_bounds = array<i64: 72, 128>}, {pipeline_mode = #tpu.pipeline_mode<synchronous>, transform_indices = @transform_2, window_bounds = array<i64: 1, 128>}, {transform_indices = @transform_3, window_bounds = array<i64: 256, 128>}, {transform_indices = @transform_4, window_bounds = array<i64: 1, 2, 128>}]} {
    %c0 = arith.constant 0 : index
    %c0_0 = arith.constant 0 : index
    %0 = vector.load %arg1[%c0, %c0_0] : memref<256x72xbf16, #tpu.memory_space<vmem>>, vector<256x72xbf16>
    %c0_1 = arith.constant 0 : index
    %c0_2 = arith.constant 0 : index
    %1 = vector.load %arg2[%c0_1, %c0_2] : memref<72x128xbf16, #tpu.memory_space<vmem>>, vector<72x128xbf16>
    %cst = arith.constant dense<0.000000e+00> : vector<256x128xf32>
    %2 = tpu.matmul %0, %1, %cst {dimension_numbers = #tpu.dot_dimension_numbers<[1], [0], [0], [1], [0, 0, 1, 1], [], []>} : vector<256x72xbf16>, vector<72x128xbf16>, vector<256x128xf32> -> vector<256x128xf32>
    %c0_3 = arith.constant 0 : index
    %c0_4 = arith.constant 0 : index
    %3 = vector.load %arg3[%c0_3, %c0_4] : memref<1x128xf32, #tpu.memory_space<vmem>>, vector<1x128xf32>
    %4 = vector.broadcast %3 : vector<1x128xf32> to vector<256x128xf32>
    %5 = arith.addf %2, %4 : vector<256x128xf32>
    %cst_5 = arith.constant 0.000000e+00 : f32
    %6 = vector.broadcast %cst_5 : f32 to vector<256x128xf32>
    %7 = arith.maximumf %5, %6 : vector<256x128xf32>
    %8 = arith.truncf %7 : vector<256x128xf32> to vector<256x128xbf16>
    %c0_6 = arith.constant 0 : index
    %c0_7 = arith.constant 0 : index
    %9 = vector.load %arg4[%c0_6, %c0_7] : memref<256x128xbf16, #tpu.memory_space<vmem>>, vector<256x128xbf16>
    tpu.vector_store %arg4[%c0_6, %c0_7], %8 {strides = array<i32>} : memref<256x128xbf16, #tpu.memory_space<vmem>>, vector<256x128xbf16>,
    %10 = arith.extf %8 : vector<256x128xbf16> to vector<256x128xf32>
    %cst_8 = arith.constant dense<0.000000e+00> : vector<128xf32>
    %11 = vector.multi_reduction <add>, %10, %cst_8 [0] : vector<256x128xf32> to vector<128xf32>
    %12 = vector.shape_cast %11 : vector<128xf32> to vector<1x128xf32>
    %13 = arith.mulf %10, %10 : vector<256x128xf32>
    %cst_9 = arith.constant dense<0.000000e+00> : vector<128xf32>
    %14 = vector.multi_reduction <add>, %13, %cst_9 [0] : vector<256x128xf32> to vector<128xf32>
    %15 = vector.shape_cast %14 : vector<128xf32> to vector<1x128xf32>
    %16 = tpu.concatenate %12, %15 in 0 : vector<1x128xf32>, vector<1x128xf32> -> vector<2x128xf32>
    %17 = vector.shape_cast %16 : vector<2x128xf32> to vector<1x2x128xf32>
    %c0_10 = arith.constant 0 : index
    %c0_11 = arith.constant 0 : index
    %c0_12 = arith.constant 0 : index
    %18 = vector.load %arg5[%c0_10, %c0_11, %c0_12] : memref<1x2x128xf32, #tpu.memory_space<vmem>>, vector<1x2x128xf32>
    tpu.vector_store %arg5[%c0_10, %c0_11, %c0_12], %17 {strides = array<i32>} : memref<1x2x128xf32, #tpu.memory_space<vmem>>, vector<1x2x128xf32>,
    return
  }
  func.func @transform_0(%arg0: i32) -> (i32, i32) {
    %c0_i32 = arith.constant 0 : i32
    %c0_i32_0 = arith.constant 0 : i32
    return %arg0, %c0_i32 : i32, i32
  }
  func.func @transform_1(%arg0: i32) -> (i32, i32) {
    %c0_i32 = arith.constant 0 : i32
    %c0_i32_0 = arith.constant 0 : i32
    %c0_i32_1 = arith.constant 0 : i32
    return %c0_i32, %c0_i32_0 : i32, i32
  }
  func.func @transform_2(%arg0: i32) -> (i32, i32) {
    %c0_i32 = arith.constant 0 : i32
    %c0_i32_0 = arith.constant 0 : i32
    %c0_i32_1 = arith.constant 0 : i32
    return %c0_i32, %c0_i32_0 : i32, i32
  }
  func.func @transform_3(%arg0: i32) -> (i32, i32) {
    %c0_i32 = arith.constant 0 : i32
    %c0_i32_0 = arith.constant 0 : i32
    return %arg0, %c0_i32 : i32, i32
  }
  func.func @transform_4(%arg0: i32) -> (i32, i32, i32) {
    %c0_i32 = arith.constant 0 : i32
    %c0_i32_0 = arith.constant 0 : i32
    %c0_i32_1 = arith.constant 0 : i32
    return %arg0, %c0_i32, %c0_i32_0 : i32, i32, i32
  }
}

module attributes {stable_mosaic.version = 11 : i64} {
  func.func @_conv_bias_kernel(%arg0: i32, %arg1: memref<64x128xbf16, #tpu.memory_space<vmem>>, %arg2: memref<128x128xbf16, #tpu.memory_space<vmem>>, %arg3: memref<1x128xf32, #tpu.memory_space<vmem>>, %arg4: memref<64x128xf32, #tpu.memory_space<vmem>>) attributes {dimension_semantics = [#tpu.dimension_semantics<parallel>], iteration_bounds = array<i64: 2>, scalar_prefetch = 0 : i64, scratch_operands = 0 : i64, tpu.core_type = #tpu.core_type<tc>, window_params = [{transform_indices = @transform_0, window_bounds = array<i64: 64, 128>}, {pipeline_mode = #tpu.pipeline_mode<synchronous>, transform_indices = @transform_1, window_bounds = array<i64: 128, 128>}, {pipeline_mode = #tpu.pipeline_mode<synchronous>, transform_indices = @transform_2, window_bounds = array<i64: 1, 128>}, {transform_indices = @transform_3, window_bounds = array<i64: 64, 128>}]} {
    %c0 = arith.constant 0 : index
    %c0_0 = arith.constant 0 : index
    %0 = vector.load %arg1[%c0, %c0_0] : memref<64x128xbf16, #tpu.memory_space<vmem>>, vector<64x128xbf16>
    %c0_1 = arith.constant 0 : index
    %c0_2 = arith.constant 0 : index
    %1 = vector.load %arg2[%c0_1, %c0_2] : memref<128x128xbf16, #tpu.memory_space<vmem>>, vector<128x128xbf16>
    %cst = arith.constant dense<0.000000e+00> : vector<64x128xf32>
    %2 = tpu.matmul %0, %1, %cst {dimension_numbers = #tpu.dot_dimension_numbers<[1], [0], [0], [1], [0, 0, 1, 1], [], []>} : vector<64x128xbf16>, vector<128x128xbf16>, vector<64x128xf32> -> vector<64x128xf32>
    %c0_3 = arith.constant 0 : index
    %c0_4 = arith.constant 0 : index
    %3 = vector.load %arg3[%c0_3, %c0_4] : memref<1x128xf32, #tpu.memory_space<vmem>>, vector<1x128xf32>
    %4 = vector.broadcast %3 : vector<1x128xf32> to vector<64x128xf32>
    %5 = arith.addf %2, %4 : vector<64x128xf32>
    %c0_5 = arith.constant 0 : index
    %c0_6 = arith.constant 0 : index
    %6 = vector.load %arg4[%c0_5, %c0_6] : memref<64x128xf32, #tpu.memory_space<vmem>>, vector<64x128xf32>
    tpu.vector_store %arg4[%c0_5, %c0_6], %5 {strides = array<i32>} : memref<64x128xf32, #tpu.memory_space<vmem>>, vector<64x128xf32>,
    return
  }
  func.func @transform_0(%arg0: i32) -> (i32, i32) {
    %c0_i32 = arith.constant 0 : i32
    %c0_i32_0 = arith.constant 0 : i32
    return %arg0, %c0_i32 : i32, i32
  }
  func.func @transform_1(%arg0: i32) -> (i32, i32) {
    %c0_i32 = arith.constant 0 : i32
    %c0_i32_0 = arith.constant 0 : i32
    %c0_i32_1 = arith.constant 0 : i32
    return %c0_i32, %c0_i32_0 : i32, i32
  }
  func.func @transform_2(%arg0: i32) -> (i32, i32) {
    %c0_i32 = arith.constant 0 : i32
    %c0_i32_0 = arith.constant 0 : i32
    %c0_i32_1 = arith.constant 0 : i32
    return %c0_i32, %c0_i32_0 : i32, i32
  }
  func.func @transform_3(%arg0: i32) -> (i32, i32) {
    %c0_i32 = arith.constant 0 : i32
    %c0_i32_0 = arith.constant 0 : i32
    return %arg0, %c0_i32 : i32, i32
  }
}

</mosaic_0001>

<bundles_post_ra>
// kernel: block_forward.7
= control target key start
LH: loop header
LB: loop body
LE: loop exit
PB: predicated region body
PF: predicated region fallthrough
CT: control target
= control target key end

     0   :  { %v126_v0 = vmov 0.0   ;;  %vm127_vm0 = vmmov 0   ;;  %vm26_vm1 = vcmask 261120   ;;  %s169_s1 = inlined_call_operand.vmem [shape: f32[32,128], index: 1, kind: input, shape index: {}]   ;;  %s170_s0 = inlined_call_operand.vmem [shape: f32[2,32], index: 0, kind: input, shape index: {}]   ;;  %s171_s2 = inlined_call_operand.vmem [shape: f32[1,128], index: 2, kind: input, shape index: {}]   ;;  %s172_s3 = inlined_call_operand.vmem [shape: f32[2,128], index: 3, kind: output, shape index: {}]  }
   0x1   :  { %113 = vmatprep.subr.mxu0 %v126_v0  ;;  %v18_v1 = vld [vmem:[%s169_s1 + $0x18] sm:$0xff]  ;;  %v17_v2 = vld [vmem:[%s169_s1 + $0x10] sm:$0xff]  ;;  %121 = vmatprep.mubr.msk.f32.mxu0 %vm127_vm0, %v126_v0  ;;  %v16_v3 = vld [vmem:[%s169_s1 + $0x8] sm:$0xff] }
   0x2   :  { %114 = vmatpush3.msra.mxu0 %v18_v1  ;;  %v15_v4 = vld [vmem:[%s169_s1] sm:$0xff] }
   0x3   :  { %115 = vmatprep.subr.mxu0 %v126_v0  ;;  %v14_v5 = vld [vmem:[%s170_s0] sm:$0x3] }
   0x4   :  { %116 = vmatpush3.msra.mxu0 %v17_v2  ;;  %v106_v6 = vld [vmem:[%s171_s2] ss:$0 sm:$0xff] }
   0x5   :  { %117 = vmatprep.subr.mxu0 %v126_v0 }
   0x6   :  { %118 = vmatpush3.msra.mxu0 %v16_v3 }
   0x7   :  { %119 = vmatprep.subr.mxu0 %v126_v0 }
   0x8   :  { %120 = vmatpush3.msra.mxu0 %v15_v4 }
   0x9   :  { %122 = vmatmul.mubr.msk.f32.vlgmr.msra.gmra.mxu0 %vm26_vm1, %v14_v5 }
  0xc9   :  { %v96_v7 = vpop.f32.mrf.mxu0 }
  0xca   :  { %v97_v8 = vadd.f32 %v106_v6, %v96_v7 }
  0xcb   :  { %v123_v9 = vpop.f32.mrf.mxu0 }
  0xcc   :  { %v100_v10 = vmax.f32 %v97_v8, 0.0 }
  0xce   :  { %101 = vst [vmem:[%s172_s3] sm:$0x3] %v100_v10 }

// kernel: block_forward.8
= control target key start
LH: loop header
LB: loop body
LE: loop exit
PB: predicated region body
PF: predicated region fallthrough
CT: control target
= control target key end

     0   :  { %s842_s12 = smov 0   ;;  %s976_s0 = inlined_call_operand.vmem [shape: bf16[512,128], index: 0, kind: input, shape index: {}]   ;;  %s977_s1 = inlined_call_operand.vmem [shape: f32[1,128], index: 1, kind: input, shape index: {}]   ;;  %s978_s2 = inlined_call_operand.vmem [shape: f32[2,1,128], index: 2, kind: input, shape index: {}]   ;;  %s979_s3 = inlined_call_operand.vmem [shape: bf16[512,128], index: 3, kind: output, shape index: {}]  }
   0x1 LB: > { %s555_s13 = sadd.s32 4294967295, %s820_s12   ;;  %p559_p0 = scmp.ge.s32.totalorder %s820_s12, 1  ;;  %s820_s12 = sphi %s842_s12, %s13_s12  }
   0x2   : > { %p146_p1 = scmp.lt.s32.totalorder %s820_s12, 3 }
   0x4   : > { %p147_p2 = pnand %p559_p0, %p146_p1 }
   0x5   : > { %s560_s14 = sshll.u32 (!%p147_p2), %s555_s13, 5  ;;  %p179_p3 = scmp.lt.s32.totalorder (!%p147_p2), %s555_s13, 1 }
   0x6   : > { %150 = sbr.rel (%p147_p2) target bundleno = 48 (0x30), region = 32  ;;  %p174_p4 = scmp.lt.s32.totalorder (!%p147_p2), %s560_s14, 63 }
   0xb   : > { %s981_s13 = smov (!%p179_p3, %s555_s13), 1  ;;  %s983_s14 = smov (!%p174_p4, %s560_s14), 63  ;;  %v866_v0 = vld [vmem:[%s977_s1] ss:$0 sm:$0xff] }
   0xc   : > { %s561_s15 = sshll.u32 %s983_s14, 2  ;;  %s181_s21 = scalar_lea.vmem %s978_s2, %s981_s13 }
   0xd   : > { %s858_s18 = scalar_lea.vmem %s976_s0, %s561_s15  ;;  %v872_v9 = vld [vmem:[%s181_s21] ss:$0 sm:$0xff]  ;;  %s893_s26 = scalar_lea.vmem %s979_s3, %s561_s15 }
   0xe   : > { %v633_v1 = vld [vmem:[%s858_s18] sm:$0xff]   ;;  %v776_v2 = vld [vmem:[%s858_s18 + $0x8] sm:$0xff]   ;;  %v777_v3 = vld [vmem:[%s858_s18 + $0x10] sm:$0xff]  }
   0xf   : > { %v634_v4 = vunpack.c.l.bf16 %v633_v1  ;;  %v635_v5 = vunpack.c.h.bf16 %v633_v1  ;;  %v638_v6 = vunpack.c.l.bf16 %v776_v2  ;;  %v639_v7 = vunpack.c.h.bf16 %v776_v2  ;;  %v778_v8 = vld [vmem:[%s858_s18 + $0x18] sm:$0xff]   ;;  %v779_v22 = vld [vmem:[%s858_s18 + $0x20] sm:$0xff]   ;;  %v780_v27 = vld [vmem:[%s858_s18 + $0x28] sm:$0xff]  }
  0x10   : > { %v642_v10 = vunpack.c.l.bf16 %v777_v3  ;;  %v643_v11 = vunpack.c.h.bf16 %v777_v3  ;;  %v646_v12 = vunpack.c.l.bf16 %v778_v8  ;;  %v647_v13 = vunpack.c.h.bf16 %v778_v8  ;;  %v781_v32 = vld [vmem:[%s858_s18 + $0x30] sm:$0xff]   ;;  %v782_v37 = vld [vmem:[%s858_s18 + $0x38] sm:$0xff]   ;;  %v783_v50 = vld [vmem:[%s858_s18 + $0x40] sm:$0xff]  }
  0x11   : > { %v259_v14 = vmul.f32 %v634_v4, %v866_v0  ;;  %v260_v15 = vmul.f32 %v635_v5, %v866_v0  ;;  %v261_v16 = vmul.f32 %v638_v6, %v866_v0  ;;  %v262_v17 = vmul.f32 %v639_v7, %v866_v0  ;;  %v784_v59 = vld [vmem:[%s858_s18 + $0x48] sm:$0xff]   ;;  %v785_v1 = vld [vmem:[%s858_s18 + $0x50] sm:$0xff]   ;;  %v786_v6 = vld [vmem:[%s858_s18 + $0x58] sm:$0xff]  }
  0x12   : > { %v263_v18 = vmul.f32 %v642_v10, %v866_v0  ;;  %v264_v19 = vmul.f32 %v643_v11, %v866_v0  ;;  %v265_v20 = vmul.f32 %v646_v12, %v866_v0  ;;  %v266_v21 = vmul.f32 %v647_v13, %v866_v0 }
  0x13   : > { %v298_v23 = vadd.f32 %v872_v9, %v259_v14  ;;  %v299_v24 = vadd.f32 %v872_v9, %v260_v15  ;;  %v300_v25 = vadd.f32 %v872_v9, %v261_v16  ;;  %v301_v26 = vadd.f32 %v872_v9, %v262_v17  ;;  %v787_v16 = vld [vmem:[%s858_s18 + $0x60] sm:$0xff]  }
  0x14   : > { %v302_v28 = vadd.f32 %v872_v9, %v263_v18  ;;  %v303_v29 = vadd.f32 %v872_v9, %v264_v19  ;;  %v304_v30 = vadd.f32 %v872_v9, %v265_v20  ;;  %v305_v31 = vadd.f32 %v872_v9, %v266_v21 }
  0x15   : > { %v699_v33 = vpack.c.bf16 %v299_v24, %v298_v23  ;;  %v704_v34 = vpack.c.bf16 %v301_v26, %v300_v25  ;;  %v650_v35 = vunpack.c.l.bf16 %v779_v22  ;;  %v651_v36 = vunpack.c.h.bf16 %v779_v22 }
  0x16   : > { %v709_v38 = vpack.c.bf16 %v303_v29, %v302_v28  ;;  %v714_v39 = vpack.c.bf16 %v305_v31, %v304_v30  ;;  %v654_v40 = vunpack.c.l.bf16 %v780_v27  ;;  %v655_v41 = vunpack.c.h.bf16 %v780_v27  ;;  %v788_v29 = vld [vmem:[%s858_s18 + $0x68] sm:$0xff]  }
  0x17   : > { %700 = vst [vmem:[%s893_s26] sm:$0xff] %v699_v33   ;;  %791 = vst [vmem:[%s893_s26 + $0x8] sm:$0xff] %v704_v34   ;;  %v267_v42 = vmul.f32 %v650_v35, %v866_v0  ;;  %v268_v43 = vmul.f32 %v651_v36, %v866_v0  ;;  %v658_v44 = vunpack.c.l.bf16 %v781_v32  ;;  %v659_v45 = vunpack.c.h.bf16 %v781_v32  ;;  %v789_v34 = vld [vmem:[%s858_s18 + $0x70] sm:$0xff]  }
  0x18   : > { %792 = vst [vmem:[%s893_s26 + $0x10] sm:$0xff] %v709_v38   ;;  %793 = vst [vmem:[%s893_s26 + $0x18] sm:$0xff] %v714_v39   ;;  %v269_v46 = vmul.f32 %v654_v40, %v866_v0  ;;  %v270_v47 = vmul.f32 %v655_v41, %v866_v0  ;;  %v662_v48 = vunpack.c.l.bf16 %v782_v37  ;;  %v663_v49 = vunpack.c.h.bf16 %v782_v37  ;;  %v790_v39 = vld [vmem:[%s858_s18 + $0x78] sm:$0xff]  }
  0x19   : > { %v306_v51 = vadd.f32 %v872_v9, %v267_v42  ;;  %v307_v52 = vadd.f32 %v872_v9, %v268_v43  ;;  %v271_v53 = vmul.f32 %v658_v44, %v866_v0  ;;  %v272_v54 = vmul.f32 %v659_v45, %v866_v0 }
  0x1a   : > { %v308_v55 = vadd.f32 %v872_v9, %v269_v46  ;;  %v309_v56 = vadd.f32 %v872_v9, %v270_v47  ;;  %v273_v57 = vmul.f32 %v662_v48, %v866_v0  ;;  %v274_v58 = vmul.f32 %v663_v49, %v866_v0 }
  0x1b   : > { %v719_v60 = vpack.c.bf16 %v307_v52, %v306_v51  ;;  %v310_v61 = vadd.f32 %v872_v9, %v271_v53  ;;  %v311_v62 = vadd.f32 %v872_v9, %v272_v54  ;;  %v666_v63 = vunpack.c.l.bf16 %v783_v50 }
  0x1c   : > { %v724_v2 = vpack.c.bf16 %v309_v56, %v308_v55  ;;  %v312_v3 = vadd.f32 %v872_v9, %v273_v57  ;;  %v313_v4 = vadd.f32 %v872_v9, %v274_v58  ;;  %v667_v5 = vunpack.c.h.bf16 %v783_v50 }
  0x1d   : > { %794 = vst [vmem:[%s893_s26 + $0x20] sm:$0xff] %v719_v60   ;;  %v729_v7 = vpack.c.bf16 %v311_v62, %v310_v61  ;;  %v275_v8 = vmul.f32 %v666_v63, %v866_v0  ;;  %v670_v10 = vunpack.c.l.bf16 %v784_v59  ;;  %v671_v11 = vunpack.c.h.bf16 %v784_v59 }
  0x1e   : > { %795 = vst [vmem:[%s893_s26 + $0x28] sm:$0xff] %v724_v2   ;;  %v734_v12 = vpack.c.bf16 %v313_v4, %v312_v3  ;;  %v276_v13 = vmul.f32 %v667_v5, %v866_v0  ;;  %v674_v14 = vunpack.c.l.bf16 %v785_v1  ;;  %v675_v15 = vunpack.c.h.bf16 %v785_v1 }
  0x1f   : > { %796 = vst [vmem:[%s893_s26 + $0x30] sm:$0xff] %v729_v7   ;;  %v314_v17 = vadd.f32 %v872_v9, %v275_v8  ;;  %v277_v18 = vmul.f32 %v670_v10, %v866_v0  ;;  %v278_v19 = vmul.f32 %v671_v11, %v866_v0  ;;  %v678_v20 = vunpack.c.l.bf16 %v786_v6 }
  0x20   : > { %797 = vst [vmem:[%s893_s26 + $0x38] sm:$0xff] %v734_v12   ;;  %v315_v21 = vadd.f32 %v872_v9, %v276_v13  ;;  %v279_v22 = vmul.f32 %v674_v14, %v866_v0  ;;  %v280_v23 = vmul.f32 %v675_v15, %v866_v0  ;;  %v679_v24 = vunpack.c.h.bf16 %v786_v6 }
  0x21   : > { %v316_v25 = vadd.f32 %v872_v9, %v277_v18  ;;  %v317_v26 = vadd.f32 %v872_v9, %v278_v19  ;;  %v281_v27 = vmul.f32 %v678_v20, %v866_v0  ;;  %v682_v28 = vunpack.c.l.bf16 %v787_v16 }
  0x22   : > { %v739_v30 = vpack.c.bf16 %v315_v21, %v314_v17  ;;  %v318_v31 = vadd.f32 %v872_v9, %v279_v22  ;;  %v319_v32 = vadd.f32 %v872_v9, %v280_v23  ;;  %v282_v33 = vmul.f32 %v679_v24, %v866_v0 }
  0x23   : > { %v744_v35 = vpack.c.bf16 %v317_v26, %v316_v25  ;;  %v320_v36 = vadd.f32 %v872_v9, %v281_v27  ;;  %v683_v37 = vunpack.c.h.bf16 %v787_v16  ;;  %v283_v38 = vmul.f32 %v682_v28, %v866_v0 }
  0x24   : > { %798 = vst [vmem:[%s893_s26 + $0x40] sm:$0xff] %v739_v30   ;;  %v749_v40 = vpack.c.bf16 %v319_v32, %v318_v31  ;;  %v321_v41 = vadd.f32 %v872_v9, %v282_v33  ;;  %v686_v42 = vunpack.c.l.bf16 %v788_v29  ;;  %v687_v43 = vunpack.c.h.bf16 %v788_v29 }
  0x25   : > { %799 = vst [vmem:[%s893_s26 + $0x48] sm:$0xff] %v744_v35   ;;  %v284_v44 = vmul.f32 %v683_v37, %v866_v0  ;;  %v322_v45 = vadd.f32 %v872_v9, %v283_v38  ;;  %v690_v46 = vunpack.c.l.bf16 %v789_v34  ;;  %v691_v47 = vunpack.c.h.bf16 %v789_v34 }
  0x26   : > { %800 = vst [vmem:[%s893_s26 + $0x50] sm:$0xff] %v749_v40   ;;  %v754_v48 = vpack.c.bf16 %v321_v41, %v320_v36  ;;  %v285_v49 = vmul.f32 %v686_v42, %v866_v0  ;;  %v286_v50 = vmul.f32 %v687_v43, %v866_v0  ;;  %v694_v51 = vunpack.c.l.bf16 %v790_v39 }
  0x27   : > { %v323_v52 = vadd.f32 %v872_v9, %v284_v44  ;;  %v287_v53 = vmul.f32 %v690_v46, %v866_v0  ;;  %v288_v54 = vmul.f32 %v691_v47, %v866_v0  ;;  %v695_v55 = vunpack.c.h.bf16 %v790_v39 }
  0x28   : > { %801 = vst [vmem:[%s893_s26 + $0x58] sm:$0xff] %v754_v48   ;;  %v324_v56 = vadd.f32 %v872_v9, %v285_v49  ;;  %v325_v57 = vadd.f32 %v872_v9, %v286_v50  ;;  %v289_v58 = vmul.f32 %v694_v51, %v866_v0 }
  0x29   : > { %v759_v59 = vpack.c.bf16 %v323_v52, %v322_v45  ;;  %v326_v60 = vadd.f32 %v872_v9, %v287_v53  ;;  %v327_v61 = vadd.f32 %v872_v9, %v288_v54  ;;  %v290_v62 = vmul.f32 %v695_v55, %v866_v0 }
  0x2a   : > { %v764_v63 = vpack.c.bf16 %v325_v57, %v324_v56  ;;  %v328_v1 = vadd.f32 %v872_v9, %v289_v58 }
  0x2b   : > { %802 = vst [vmem:[%s893_s26 + $0x60] sm:$0xff] %v759_v59   ;;  %v769_v2 = vpack.c.bf16 %v327_v61, %v326_v60  ;;  %v329_v3 = vadd.f32 %v872_v9, %v290_v62 }
  0x2c   : > { %803 = vst [vmem:[%s893_s26 + $0x68] sm:$0xff] %v764_v63  }
  0x2d   : > { %804 = vst [vmem:[%s893_s26 + $0x70] sm:$0xff] %v769_v2   ;;  %v774_v4 = vpack.c.bf16 %v329_v3, %v328_v1 }
  0x2f   : > { %805 = vst [vmem:[%s893_s26 + $0x78] sm:$0xff] %v774_v4  }
  0x30 PF: > { %s13_s12 = sadd.s32 1, %s820_s12  }
  0x31   : > { %p10_p5 = scmp.ge.s32.totalorder %s13_s12, 4  }
  0x33   :  { %12 = sbr.rel (!%p10_p5) target bundleno = 1 (0x1), region = 65 }

// kernel: block_forward.6
= control target key start
LH: loop header
LB: loop body
LE: loop exit
PB: predicated region body
PF: predicated region fallthrough
CT: control target
= control target key end

     0   :  { %s1318_s15 = smov 0   ;;  %s1474_s0 = inlined_call_operand.vmem [shape: bf16[512,36], index: 0, kind: input, shape index: {}]   ;;  %s1475_s1 = inlined_call_operand.vmem [shape: bf16[36,128], index: 1, kind: input, shape index: {}]   ;;  %s1476_s2 = inlined_call_operand.vmem [shape: f32[1,128], index: 2, kind: input, shape index: {}]   ;;  %s1477_s3 = inlined_call_operand.vmem [shape: bf16[512,128], index: 3, kind: output, shape index: {0}]   ;;  %s1478_s4 = inlined_call_operand.vmem [shape: f32[2,2,128], index: 4, kind: output, shape index: {1}]  }
   0x1 LB: > { %s1324_s16 = sadd.s32 4294967295, %s1291_s15   ;;  %p990_p0 = scmp.ge.s32.totalorder %s1291_s15, 1  ;;  %s1291_s15 = sphi %s1318_s15, %s15_s15  }
   0x2   : > { %p166_p1 = scmp.lt.s32.totalorder %s1291_s15, 3 }
   0x4   : > { %p167_p2 = pnand %p990_p0, %p166_p1 }
   0x5   : > { %s991_s21 = sshll.u32 (!%p167_p2), %s1324_s16, 5  ;;  %p208_p4 = scmp.lt.s32.totalorder (!%p167_p2), %s1324_s16, 1 }
   0x6   : > { %170 = sbr.rel (%p167_p2) target bundleno = 311 (0x137), region = 32  ;;  %p197_p3 = scmp.lt.s32.totalorder (!%p167_p2), %s991_s21, 63 }
   0xb   : > { %v1266_v0 = vld [vmem:[%s1475_s1 + $0x10] ss:$0 sps:$4 sm:$0x33]   ;;  %vm401_vm0 = vcmask 1041408   ;;  %v1267_v1 = vld [vmem:[%s1475_s1 + $0x8] sm:$0xff]   ;;  %v1268_v3 = vld [vmem:[%s1475_s1] sm:$0xff]  }
   0xc   : > { %1256 = vmatprep.subr.msk.bf16.mxu0 %vm401_vm0, %v1266_v0  ;;  %v403_v2 = vsel %vm401_vm0, %v1266_v0, 0  ;;  %1257 = vmatprep.subr.msk.bf16.mxu1 %vm401_vm0, %v1266_v0  ;;  %s1480_s21 = smov (!%p197_p3, %s991_s21), 63  ;;  %vm352_vm1 = vcmask 293888   ;;  %v1383_v21 = vld [vmem:[%s1476_s2] ss:$0 sm:$0xff]  ;;  %s1482_s16 = smov (!%p208_p4, %s1324_s16), 1 }
   0xd   : > { %1213 = vmatpush3.bf16.msra.mxu0 %v403_v2  ;;  %1253 = vmatpush3.bf16.msra.mxu1 %v403_v2  ;;  %s992_s24 = sshll.u32 %s1480_s21, 2  ;;  %s995_s7 = sshll.u32 %s1482_s16, 1  ;;  %vm896_vm2 = vcmask 1040384  }
   0xe   : > { %1214 = vmatprep.subr.bf16.mxu0 %v1267_v1  ;;  %1251 = vmatprep.subr.bf16.mxu1 %v1267_v1  ;;  %s1346_s27 = scalar_lea.vmem %s1474_s0, %s992_s24  ;;  %s1394_s6 = scalar_lea.vmem %s1477_s3, %s992_s24 }
   0xf   : > { %v1269_v4 = vld [vmem:[%s1346_s27] sm:$0xff]   ;;  %v1270_v5 = vld [vmem:[%s1346_s27 + $0x8] sm:$0xff]   ;;  %v1271_v6 = vld [vmem:[%s1346_s27 + $0x10] sm:$0xff]   ;;  %s211_s10 = scalar_lea.vmem %s1478_s4, %s995_s7 }
  0x10   : > { %1218 = vmatprep.mubr.msk.bf16.mxu0 %vm352_vm1, %v1269_v4  ;;  %v1272_v7 = vld [vmem:[%s1346_s27 + $0x18] sm:$0xff]   ;;  %v1273_v8 = vld [vmem:[%s1346_s27 + $0x20] sm:$0xff]   ;;  %v1278_v10 = vld [vmem:[%s1346_s27 + $0x48] sm:$0xff]  }
  0x11   : > { %1215 = vmatpush3.bf16.msra.mxu0 %v1267_v1  ;;  %1254 = vmatpush3.bf16.msra.mxu1 %v1267_v1  ;;  %v1277_v9 = vld [vmem:[%s1346_s27 + $0x40] sm:$0xff]   ;;  %v1279_v11 = vld [vmem:[%s1346_s27 + $0x50] sm:$0xff]   ;;  %v1280_v12 = vld [vmem:[%s1346_s27 + $0x58] sm:$0xff]  }
  0x12   : > { %1216 = vmatprep.subr.bf16.mxu0 %v1268_v3  ;;  %1252 = vmatprep.subr.bf16.mxu1 %v1268_v3  ;;  %v1281_v13 = vld [vmem:[%s1346_s27 + $0x60] sm:$0xff]   ;;  %v1274_v14 = vld [vmem:[%s1346_s27 + $0x28] sm:$0xff]   ;;  %v1275_v15 = vld [vmem:[%s1346_s27 + $0x30] sm:$0xff]  }
  0x13   : > { %1234 = vmatprep.mubr.msk.bf16.mxu1 %vm352_vm1, %v1277_v9  ;;  %v1282_v16 = vld [vmem:[%s1346_s27 + $0x68] sm:$0xff]   ;;  %v1283_v17 = vld [vmem:[%s1346_s27 + $0x70] sm:$0xff]   ;;  %v1276_v18 = vld [vmem:[%s1346_s27 + $0x38] sm:$0xff]  }
  0x14   : > { %v1284_v19 = vld [vmem:[%s1346_s27 + $0x78] sm:$0xff]  }
  0x15   : > { %1217 = vmatpush3.bf16.msra.mxu0 %v1268_v3  ;;  %1255 = vmatpush3.bf16.msra.mxu1 %v1268_v3 }
  0x18   : > { %1219 = vmatmul.mubr.msk.bf16.vlgmr.msra.gmra.mxu0 %vm352_vm1, %v1270_v5  ;;  %1235 = vmatmul.mubr.msk.bf16.vlgmr.msra.gmra.mxu1 %vm352_vm1, %v1278_v10 }
  0x19   : > { %1222 = vmatprep.mubr.msk.bf16.mxu0 %vm352_vm1, %v1271_v6  ;;  %1238 = vmatprep.mubr.msk.bf16.mxu1 %vm352_vm1, %v1279_v11 }
  0x20   : > { %1223 = vmatmul.mubr.msk.bf16.gmra.mxu0 %vm352_vm1, %v1272_v7  ;;  %1239 = vmatmul.mubr.msk.bf16.gmra.mxu1 %vm352_vm1, %v1280_v12 }
  0x21   : > { %1226 = vmatprep.mubr.msk.bf16.mxu0 %vm352_vm1, %v1273_v8  ;;  %1242 = vmatprep.mubr.msk.bf16.mxu1 %vm352_vm1, %v1281_v13 }
  0x28   : > { %1227 = vmatmul.mubr.msk.bf16.gmra.mxu0 %vm352_vm1, %v1274_v14  ;;  %1243 = vmatmul.mubr.msk.bf16.gmra.mxu1 %vm352_vm1, %v1282_v16 }
  0x29   : > { %1230 = vmatprep.mubr.msk.bf16.mxu0 %vm352_vm1, %v1275_v15  ;;  %1246 = vmatprep.mubr.msk.bf16.mxu1 %vm352_vm1, %v1283_v17 }
  0x30   : > { %1231 = vmatmul.mubr.msk.bf16.gmra.mxu0 %vm352_vm1, %v1276_v18  ;;  %1247 = vmatmul.mubr.msk.bf16.gmra.mxu1 %vm352_vm1, %v1284_v19 }
  0xd8   : > { %v1220_v20 = vpop.f32.mrf.mxu0  ;;  %v1236_v28 = vpop.f32.mrf.mxu1 }
  0xd9   : > { %v448_v23 = vadd.f32 %v1220_v20, %v1383_v21  ;;  %v512_v33 = vadd.f32 %v1236_v28, %v1383_v21 }
  0xda   : > { %v439_v22 = vpop.f32.mrf.mxu0  ;;  %v503_v34 = vpop.f32.mrf.mxu1 }
  0xdb   : > { %v440_v25 = vadd.f32 %v1383_v21, %v439_v22  ;;  %v568_v29 = vmax.f32 %v448_v23, 0.0  ;;  %v504_v40 = vadd.f32 %v1383_v21, %v503_v34  ;;  %v584_v46 = vmax.f32 %v512_v33, 0.0 }
  0xdc   : > { %v1221_v24 = vpop.f32.mrf.mxu0  ;;  %v1237_v41 = vpop.f32.mrf.mxu1 }
  0xdd   : > { %v451_v26 = vadd.f32 %v1221_v24, %v1383_v21  ;;  %v566_v35 = vmax.f32 %v440_v25, 0.0  ;;  %v515_v47 = vadd.f32 %v1237_v41, %v1383_v21  ;;  %v582_v55 = vmax.f32 %v504_v40, 0.0 }
  0xde   : > { %v442_v27 = vpop.f32.mrf.mxu0  ;;  %v506_v48 = vpop.f32.mrf.mxu1 }
  0xdf   : > { %v569_v30 = vmax.f32 %v451_v26, 0.0  ;;  %v443_v31 = vadd.f32 %v1383_v21, %v442_v27  ;;  %v585_v56 = vmax.f32 %v515_v47, 0.0  ;;  %v507_v57 = vadd.f32 %v1383_v21, %v506_v48 }
  0xe0   : > { %v1224_v32 = vpop.f32.mrf.mxu0  ;;  %v1240_v58 = vpop.f32.mrf.mxu1 }
  0xe1   : > { %v599_v36 = vpack.c.bf16 %v569_v30, %v568_v29  ;;  %v567_v37 = vmax.f32 %v443_v31, 0.0  ;;  %v464_v38 = vadd.f32 %v1224_v32, %v1383_v21  ;;  %v1406_v2 = vpack.c.bf16 %v585_v56, %v584_v46 }
  0xe2   : > { %v455_v39 = vpop.f32.mrf.mxu0  ;;  %v583_v3 = vmax.f32 %v507_v57, 0.0  ;;  %v519_v4 = vpop.f32.mrf.mxu1 }
  0xe3   : > { %1178 = vst [vmem:[%s1394_s6 + $0x8] sm:$0xff] %v599_v36   ;;  %v598_v42 = vpack.c.bf16 %v567_v37, %v566_v35  ;;  %v760_v43 = vunpack.c.l.bf16 %v599_v36  ;;  %v761_v44 = vunpack.c.h.bf16 %v599_v36  ;;  %v572_v51 = vmax.f32 %v464_v38, 0.0  ;;  %1186 = vst [vmem:[%s1394_s6 + $0x48] sm:$0xff] %v1406_v2  }
  0xe4   : > { %v1225_v45 = vpop.f32.mrf.mxu0  ;;  %v456_v52 = vadd.f32 %v1383_v21, %v455_v39  ;;  %v1411_v12 = vpack.c.bf16 %v583_v3, %v582_v55  ;;  %v1241_v13 = vpop.f32.mrf.mxu1  ;;  %v528_v36 = vadd.f32 %v1240_v58, %v1383_v21 }
  0xe5   : > { %1102 = vst [vmem:[%s1394_s6] sm:$0xff] %v598_v42   ;;  %v758_v49 = vunpack.c.l.bf16 %v598_v42  ;;  %v759_v50 = vunpack.c.h.bf16 %v598_v42  ;;  %v467_v53 = vadd.f32 %v1225_v45, %v1383_v21  ;;  %v829_v63 = vmul.f32 %v760_v43, %v760_v43 }
  0xe6   : > { %v458_v54 = vpop.f32.mrf.mxu0  ;;  %v570_v7 = vmax.f32 %v456_v52, 0.0  ;;  %v830_v16 = vmul.f32 %v761_v44, %v761_v44  ;;  %1185 = vst [vmem:[%s1394_s6 + $0x40] sm:$0xff] %v1411_v12   ;;  %v522_v18 = vpop.f32.mrf.mxu1  ;;  %v520_v45 = vadd.f32 %v1383_v21, %v519_v4  ;;  %v588_v55 = vmax.f32 %v528_v36, 0.0 }
  0xe7   : > { %v790_v59 = vadd.f32 %v759_v50, %v758_v49  ;;  %v827_v60 = vmul.f32 %v758_v49, %v758_v49  ;;  %v828_v61 = vmul.f32 %v759_v50, %v759_v50  ;;  %v459_v62 = vadd.f32 %v1383_v21, %v458_v54 }
  0xe8   : > { %v573_v0 = vmax.f32 %v467_v53, 0.0  ;;  %v1228_v1 = vpop.f32.mrf.mxu0  ;;  %v1419_v29 = vpop.f32.mrf.mxu1 }
  0xe9   : > { %v791_v5 = vadd.f32 %v790_v59, %v760_v43  ;;  %v859_v6 = vadd.f32 %v828_v61, %v827_v60  ;;  %v571_v8 = vmax.f32 %v459_v62, 0.0  ;;  %v480_v10 = vadd.f32 %v1228_v1, %v1383_v21 }
  0xea   : > { %v601_v9 = vpack.c.bf16 %v573_v0, %v572_v51  ;;  %v471_v11 = vpop.f32.mrf.mxu0  ;;  %v535_v37 = vpop.f32.mrf.mxu1  ;;  %v586_v1 = vmax.f32 %v520_v45, 0.0 }
  0xeb   : > { %v860_v14 = vadd.f32 %v859_v6, %v829_v63  ;;  %v600_v15 = vpack.c.bf16 %v571_v8, %v570_v7  ;;  %v792_v22 = vadd.f32 %v791_v5, %v761_v44  ;;  %v576_v26 = vmax.f32 %v480_v10, 0.0 }
  0xec   : > { %1180 = vst [vmem:[%s1394_s6 + $0x18] sm:$0xff] %v601_v9   ;;  %v1229_v17 = vpop.f32.mrf.mxu0  ;;  %v764_v24 = vunpack.c.l.bf16 %v601_v9  ;;  %v765_v25 = vunpack.c.h.bf16 %v601_v9  ;;  %v472_v27 = vadd.f32 %v1383_v21, %v471_v11  ;;  %v1424_v46 = vpop.f32.mrf.mxu1  ;;  %v531_v6 = vadd.f32 %v1241_v13, %v1383_v21 }
  0xed   : > { %1179 = vst [vmem:[%s1394_s6 + $0x10] sm:$0xff] %v600_v15   ;;  %v762_v19 = vunpack.c.l.bf16 %v600_v15  ;;  %v763_v20 = vunpack.c.h.bf16 %v600_v15  ;;  %v483_v23 = vadd.f32 %v1229_v17, %v1383_v21  ;;  %v861_v32 = vadd.f32 %v860_v14, %v830_v16 }
  0xee   : > { %v474_v28 = vpop.f32.mrf.mxu0  ;;  %v574_v42 = vmax.f32 %v472_v27, 0.0  ;;  %v833_v47 = vmul.f32 %v764_v24, %v764_v24  ;;  %v834_v48 = vmul.f32 %v765_v25, %v765_v25  ;;  %v538_v56 = vpop.f32.mrf.mxu1  ;;  %v523_v7 = vadd.f32 %v1383_v21, %v522_v18 }
  0xef   : > { %v793_v30 = vadd.f32 %v792_v22, %v762_v19  ;;  %v831_v31 = vmul.f32 %v762_v19, %v762_v19  ;;  %v577_v33 = vmax.f32 %v483_v23, 0.0  ;;  %v475_v34 = vadd.f32 %v1383_v21, %v474_v28 }
  0xf0   : > { %v1232_v35 = vpop.f32.mrf.mxu0  ;;  %v832_v39 = vmul.f32 %v763_v20, %v763_v20  ;;  %v1248_v3 = vpop.f32.mrf.mxu1  ;;  %v589_v16 = vmax.f32 %v531_v6, 0.0  ;;  %v587_v17 = vmax.f32 %v523_v7, 0.0  ;;  %v776_v6 = vunpack.c.l.bf16 %v1406_v2 }
  0xf1   : > { %v794_v38 = vadd.f32 %v793_v30, %v763_v20  ;;  %v862_v40 = vadd.f32 %v861_v32, %v831_v31  ;;  %v603_v41 = vpack.c.bf16 %v577_v33, %v576_v26  ;;  %v575_v43 = vmax.f32 %v475_v34, 0.0 }
  0xf2   : > { %v487_v44 = vpop.f32.mrf.mxu0  ;;  %v496_v53 = vadd.f32 %v1232_v35, %v1383_v21  ;;  %v551_v19 = vpop.f32.mrf.mxu1  ;;  %v1436_v18 = vpack.c.bf16 %v587_v17, %v586_v1  ;;  %v544_v30 = vadd.f32 %v1419_v29, %v1383_v21  ;;  %v536_v33 = vadd.f32 %v1383_v21, %v535_v37 }
  0xf3   : > { %v795_v49 = vadd.f32 %v794_v38, %v764_v24  ;;  %v863_v50 = vadd.f32 %v862_v40, %v832_v39  ;;  %1182 = vst [vmem:[%s1394_s6 + $0x28] sm:$0xff] %v603_v41   ;;  %v768_v51 = vunpack.c.l.bf16 %v603_v41  ;;  %v602_v52 = vpack.c.bf16 %v575_v43, %v574_v42 }
  0xf4   : > { %v1233_v54 = vpop.f32.mrf.mxu0  ;;  %v769_v58 = vunpack.c.h.bf16 %v603_v41  ;;  %v488_v60 = vadd.f32 %v1383_v21, %v487_v44  ;;  %v580_v10 = vmax.f32 %v496_v53, 0.0  ;;  %1187 = vst [vmem:[%s1394_s6 + $0x50] sm:$0xff] %v1436_v18   ;;  %v1249_v34 = vpop.f32.mrf.mxu1  ;;  %v774_v41 = vunpack.c.l.bf16 %v1411_v12 }
  0xf5   : > { %v864_v57 = vadd.f32 %v863_v50, %v833_v47  ;;  %v796_v59 = vadd.f32 %v795_v49, %v765_v25  ;;  %1181 = vst [vmem:[%s1394_s6 + $0x20] sm:$0xff] %v602_v52   ;;  %v766_v61 = vunpack.c.l.bf16 %v602_v52  ;;  %v767_v62 = vunpack.c.h.bf16 %v602_v52 }
  0xf6   : > { %v499_v63 = vadd.f32 %v1233_v54, %v1383_v21  ;;  %v490_v0 = vpop.f32.mrf.mxu0  ;;  %v578_v14 = vmax.f32 %v488_v60, 0.0  ;;  %v1434_v25 = vpack.c.bf16 %v589_v16, %v588_v55  ;;  %v837_v26 = vmul.f32 %v768_v51, %v768_v51  ;;  %v554_v50 = vpop.f32.mrf.mxu1 }
  0xf7   : > { %v865_v4 = vadd.f32 %v864_v57, %v834_v48  ;;  %v491_v5 = vadd.f32 %v1383_v21, %v490_v0  ;;  %v797_v8 = vadd.f32 %v796_v59, %v766_v61  ;;  %v835_v9 = vmul.f32 %v766_v61, %v766_v61 }
  0xf8   : > { %v581_v11 = vmax.f32 %v499_v63, 0.0  ;;  %v836_v22 = vmul.f32 %v767_v62, %v767_v62  ;;  %v838_v31 = vmul.f32 %v769_v58, %v769_v58  ;;  %1188 = vst [vmem:[%s1394_s6 + $0x58] sm:$0xff] %v1434_v25   ;;  %v775_v42 = vunpack.c.h.bf16 %v1411_v12 }
  0xf9   : > { %v579_v15 = vmax.f32 %v491_v5, 0.0  ;;  %v798_v20 = vadd.f32 %v797_v8, %v767_v62  ;;  %v866_v23 = vadd.f32 %v865_v4, %v835_v9  ;;  %v592_v45 = vmax.f32 %v544_v30, 0.0 }
  0xfa   : > { %v605_v24 = vpack.c.bf16 %v581_v11, %v580_v10  ;;  %v590_v47 = vmax.f32 %v536_v33, 0.0  ;;  %v547_v48 = vadd.f32 %v1424_v46, %v1383_v21  ;;  %v539_v37 = vadd.f32 %v1383_v21, %v538_v56 }
  0xfb   : > { %v604_v13 = vpack.c.bf16 %v579_v15, %v578_v14  ;;  %v799_v27 = vadd.f32 %v798_v20, %v768_v51  ;;  %v867_v28 = vadd.f32 %v866_v23, %v836_v22  ;;  %v560_v49 = vadd.f32 %v1248_v3, %v1383_v21 }
  0xfc   : > { %1184 = vst [vmem:[%s1394_s6 + $0x38] sm:$0xff] %v605_v24   ;;  %v772_v36 = vunpack.c.l.bf16 %v605_v24  ;;  %v773_v29 = vunpack.c.h.bf16 %v605_v24  ;;  %v593_v55 = vmax.f32 %v547_v48, 0.0  ;;  %v591_v57 = vmax.f32 %v539_v37, 0.0 }
  0xfd   : > { %1183 = vst [vmem:[%s1394_s6 + $0x30] sm:$0xff] %v604_v13   ;;  %v770_v32 = vunpack.c.l.bf16 %v604_v13  ;;  %v868_v35 = vadd.f32 %v867_v28, %v837_v26  ;;  %v771_v38 = vunpack.c.h.bf16 %v604_v13  ;;  %v800_v39 = vadd.f32 %v799_v27, %v769_v58 }
  0xfe   : > { %v841_v51 = vmul.f32 %v772_v36, %v772_v36  ;;  %v596_v12 = vmax.f32 %v560_v49, 0.0  ;;  %v552_v58 = vadd.f32 %v1383_v21, %v551_v19  ;;  %v563_v46 = vadd.f32 %v1249_v34, %v1383_v21 }
  0xff   : > { %v839_v40 = vmul.f32 %v770_v32, %v770_v32  ;;  %v801_v43 = vadd.f32 %v800_v39, %v770_v32  ;;  %v869_v44 = vadd.f32 %v868_v35, %v838_v31  ;;  %v840_v53 = vmul.f32 %v771_v38, %v771_v38 }
 0x100   : > { %v555_v56 = vadd.f32 %v1383_v21, %v554_v50  ;;  %v842_v61 = vmul.f32 %v773_v29, %v773_v29  ;;  %v611_v62 = vpack.c.bf16 %v593_v55, %v592_v45  ;;  %v610_v63 = vpack.c.bf16 %v591_v57, %v590_v47 }
 0x101   : > { %v802_v52 = vadd.f32 %v801_v43, %v771_v38  ;;  %v870_v54 = vadd.f32 %v869_v44, %v839_v40  ;;  %v594_v0 = vmax.f32 %v552_v58, 0.0  ;;  %v597_v4 = vmax.f32 %v563_v46, 0.0 }
 0x102   : > { %v595_v5 = vmax.f32 %v555_v56, 0.0  ;;  %v843_v7 = vmul.f32 %v774_v41, %v774_v41  ;;  %1190 = vst [vmem:[%s1394_s6 + $0x68] sm:$0xff] %v611_v62   ;;  %1189 = vst [vmem:[%s1394_s6 + $0x60] sm:$0xff] %v610_v63   ;;  %v777_v21 = vunpack.c.h.bf16 %v1406_v2  ;;  %v844_v15 = vmul.f32 %v775_v42, %v775_v42 }
 0x103   : > { %v803_v59 = vadd.f32 %v802_v52, %v772_v36  ;;  %v871_v60 = vadd.f32 %v870_v54, %v840_v53  ;;  %v613_v10 = vpack.c.bf16 %v597_v4, %v596_v12  ;;  %v845_v17 = vmul.f32 %v776_v6, %v776_v6 }
 0x104   : > { %v612_v11 = vpack.c.bf16 %v595_v5, %v594_v0  ;;  %v778_v22 = vunpack.c.l.bf16 %v1436_v18  ;;  %v846_v23 = vmul.f32 %v777_v21, %v777_v21  ;;  %v779_v13 = vunpack.c.h.bf16 %v1436_v18 }
 0x105   : > { %v872_v1 = vadd.f32 %v871_v60, %v841_v51  ;;  %v804_v3 = vadd.f32 %v803_v59, %v773_v29  ;;  %1192 = vst [vmem:[%s1394_s6 + $0x78] sm:$0xff] %v613_v10   ;;  %v780_v27 = vunpack.c.l.bf16 %v1434_v25  ;;  %v781_v31 = vunpack.c.h.bf16 %v1434_v25 }
 0x106   : > { %1191 = vst [vmem:[%s1394_s6 + $0x70] sm:$0xff] %v612_v11   ;;  %v847_v30 = vmul.f32 %v778_v22, %v778_v22  ;;  %v848_v33 = vmul.f32 %v779_v13, %v779_v13  ;;  %v782_v39 = vunpack.c.l.bf16 %v610_v63  ;;  %v784_v18 = vunpack.c.l.bf16 %v611_v62 }
 0x107   : > { %v805_v8 = vadd.f32 %v804_v3, %v774_v41  ;;  %v873_v9 = vadd.f32 %v872_v1, %v842_v61  ;;  %v849_v35 = vmul.f32 %v780_v27, %v780_v27  ;;  %v850_v40 = vmul.f32 %v781_v31, %v781_v31 }
 0x108   : > { %v851_v44 = vmul.f32 %v782_v39, %v782_v39  ;;  %v785_v47 = vunpack.c.h.bf16 %v611_v62  ;;  %v853_v25 = vmul.f32 %v784_v18, %v784_v18  ;;  %v786_v52 = vunpack.c.l.bf16 %v612_v11 }
 0x109   : > { %v806_v14 = vadd.f32 %v805_v8, %v775_v42  ;;  %v874_v16 = vadd.f32 %v873_v9, %v843_v7  ;;  %v783_v42 = vunpack.c.h.bf16 %v610_v63  ;;  %v787_v55 = vunpack.c.h.bf16 %v612_v11 }
 0x10a   : > { %v854_v53 = vmul.f32 %v785_v47, %v785_v47  ;;  %v788_v12 = vunpack.c.l.bf16 %v613_v10  ;;  %v855_v59 = vmul.f32 %v786_v52, %v786_v52  ;;  %v789_v46 = vunpack.c.h.bf16 %v613_v10 }
 0x10b   : > { %v807_v19 = vadd.f32 %v806_v14, %v776_v6  ;;  %v875_v20 = vadd.f32 %v874_v16, %v844_v15  ;;  %v852_v37 = vmul.f32 %v783_v42, %v783_v42  ;;  %v856_v61 = vmul.f32 %v787_v55, %v787_v55 }
 0x10c   : > { %v857_v63 = vmul.f32 %v788_v12, %v788_v12  ;;  %v858_v3 = vmul.f32 %v789_v46, %v789_v46 }
 0x10d   : > { %v876_v24 = vadd.f32 %v875_v20, %v845_v17  ;;  %v808_v26 = vadd.f32 %v807_v19, %v777_v21 }
 0x10f   : > { %v809_v28 = vadd.f32 %v808_v26, %v778_v22  ;;  %v877_v2 = vadd.f32 %v876_v24, %v846_v23 }
 0x111   : > { %v810_v32 = vadd.f32 %v809_v28, %v779_v13  ;;  %v878_v34 = vadd.f32 %v877_v2, %v847_v30 }
 0x113   : > { %v811_v36 = vadd.f32 %v810_v32, %v780_v27  ;;  %v879_v38 = vadd.f32 %v878_v34, %v848_v33 }
 0x115   : > { %v880_v41 = vadd.f32 %v879_v38, %v849_v35  ;;  %v812_v29 = vadd.f32 %v811_v36, %v781_v31 }
 0x117   : > { %v813_v43 = vadd.f32 %v812_v29, %v782_v39  ;;  %v881_v45 = vadd.f32 %v880_v41, %v850_v40 }
 0x119   : > { %v814_v48 = vadd.f32 %v813_v43, %v783_v42  ;;  %v882_v49 = vadd.f32 %v881_v45, %v851_v44 }
 0x11b   : > { %v815_v50 = vadd.f32 %v814_v48, %v784_v18  ;;  %v883_v51 = vadd.f32 %v882_v49, %v852_v37 }
 0x11d   : > { %v884_v54 = vadd.f32 %v883_v51, %v853_v25  ;;  %v816_v57 = vadd.f32 %v815_v50, %v785_v47 }
 0x11f   : > { %v817_v58 = vadd.f32 %v816_v57, %v786_v52  ;;  %v885_v60 = vadd.f32 %v884_v54, %v854_v53 }
 0x121   : > { %v818_v56 = vadd.f32 %v817_v58, %v787_v55  ;;  %v886_v62 = vadd.f32 %v885_v60, %v855_v59 }
 0x123   : > { %v819_v0 = vadd.f32 %v818_v56, %v788_v12  ;;  %v887_v1 = vadd.f32 %v886_v62, %v856_v61 }
 0x125   : > { %v820_v4 = vadd.f32 %v819_v0, %v789_v46  ;;  %v888_v5 = vadd.f32 %v887_v1, %v857_v63 }
 0x127   : > { %v821_v6 = vrot.slane %v820_v4, 4  ;;  %v889_v7 = vadd.f32 %v888_v5, %v858_v3 }
 0x129   : > { %v822_v8 = vadd.f32 %v821_v6, %v820_v4  ;;  %v890_v9 = vrot.slane %v889_v7, 4 }
 0x12b   : > { %v823_v11 = vrot.slane %v822_v8, 2  ;;  %v891_v21 = vadd.f32 %v890_v9, %v889_v7 }
 0x12d   : > { %v824_v14 = vadd.f32 %v823_v11, %v822_v8  ;;  %v892_v10 = vrot.slane %v891_v21, 2 }
 0x12f   : > { %v825_v15 = vrot.slane %v824_v14, 1  ;;  %v893_v16 = vadd.f32 %v892_v10, %v891_v21 }
 0x131   : > { %v894_v17 = vrot.slane %v893_v16, 1  ;;  %v826_v19 = vadd.f32 %v825_v15, %v824_v14 }
 0x133   : > { %v895_v20 = vadd.f32 %v894_v17, %v893_v16 }
 0x135   : > { %v897_v22 = vsel %vm896_vm2, %v826_v19, %v895_v20 }
 0x136   : > { %898 = vst [vmem:[%s211_s10] sm:$0x3] %v897_v22 }
 0x137 PF: > { %s15_s15 = sadd.s32 1, %s1291_s15  }
 0x138   : > { %p12_p5 = scmp.ge.s32.totalorder %s15_s15, 4  }
 0x13a   :  { %14 = sbr.rel (!%p12_p5) target bundleno = 1 (0x1), region = 74 }

// kernel: block_forward.9
= control target key start
LH: loop header
LB: loop body
LE: loop exit
PB: predicated region body
PF: predicated region fallthrough
CT: control target
= control target key end

     0   :  { %s1348_s15 = smov 0   ;;  %s1522_s0 = inlined_call_operand.vmem [shape: bf16[512,72], index: 0, kind: input, shape index: {}]   ;;  %s1523_s1 = inlined_call_operand.vmem [shape: bf16[72,128], index: 1, kind: input, shape index: {}]   ;;  %s1524_s2 = inlined_call_operand.vmem [shape: f32[1,128], index: 2, kind: input, shape index: {}]   ;;  %s1525_s3 = inlined_call_operand.vmem [shape: bf16[512,128], index: 3, kind: output, shape index: {0}]   ;;  %s1526_s4 = inlined_call_operand.vmem [shape: f32[2,2,128], index: 4, kind: output, shape index: {1}]  }
   0x1 LB: > { %s1354_s16 = sadd.s32 4294967295, %s1321_s15   ;;  %p1006_p0 = scmp.ge.s32.totalorder %s1321_s15, 1  ;;  %s1321_s15 = sphi %s1348_s15, %s15_s15  }
   0x2   : > { %p166_p1 = scmp.lt.s32.totalorder %s1321_s15, 3 }
   0x4   : > { %p167_p2 = pnand %p1006_p0, %p166_p1 }
   0x5   : > { %s1007_s21 = sshll.u32 (!%p167_p2), %s1354_s16, 5  ;;  %p208_p4 = scmp.lt.s32.totalorder (!%p167_p2), %s1354_s16, 1 }
   0x6   : > { %170 = sbr.rel (%p167_p2) target bundleno = 320 (0x140), region = 32  ;;  %p197_p3 = scmp.lt.s32.totalorder (!%p167_p2), %s1007_s21, 63 }
   0xb   : > { %v1294_v0 = vld [vmem:[%s1523_s1 + $0x20] ss:$0 sps:$4 sm:$0xff]   ;;  %vm417_vm0 = vcmask 1043456   ;;  %v1295_v1 = vld [vmem:[%s1523_s1 + $0x18] sm:$0xff]   ;;  %v1296_v3 = vld [vmem:[%s1523_s1 + $0x10] sm:$0xff]   ;;  %s1528_s21 = smov (!%p197_p3, %s1007_s21), 63 }
   0xc   : > { %1284 = vmatprep.subr.msk.bf16.mxu0 %vm417_vm0, %v1294_v0  ;;  %v419_v2 = vsel %vm417_vm0, %v1294_v0, 0  ;;  %1285 = vmatprep.subr.msk.bf16.mxu1 %vm417_vm0, %v1294_v0  ;;  %v1297_v4 = vld [vmem:[%s1523_s1 + $0x8] sm:$0xff]   ;;  %s1008_s26 = sshll.u32 %s1528_s21, 2  ;;  %vm368_vm1 = vcmask 588800   ;;  %v1298_v6 = vld [vmem:[%s1523_s1] sm:$0xff]   ;;  %s1530_s16 = smov (!%p208_p4, %s1354_s16), 1 }
   0xd   : > { %1233 = vmatpush3.bf16.msra.mxu0 %v419_v2  ;;  %1279 = vmatpush3.bf16.msra.mxu1 %v419_v2  ;;  %s1379_s29 = scalar_lea.vmem %s1522_s0, %s1008_s26  ;;  %v1419_v22 = vld [vmem:[%s1524_s2] ss:$0 sm:$0xff]  ;;  %s1434_s10 = scalar_lea.vmem %s1525_s3, %s1008_s26  ;;  %vm912_vm2 = vcmask 1040384  }
   0xe   : > { %1234 = vmatprep.subr.bf16.mxu0 %v1295_v1  ;;  %1275 = vmatprep.subr.bf16.mxu1 %v1295_v1  ;;  %v1299_v5 = vld [vmem:[%s1379_s29] sm:$0xff]   ;;  %v1300_v7 = vld [vmem:[%s1379_s29 + $0x8] sm:$0xff]   ;;  %v1301_v8 = vld [vmem:[%s1379_s29 + $0x10] sm:$0xff]   ;;  %s1011_s11 = sshll.u32 %s1530_s16, 1 }
   0xf   : > { %1242 = vmatprep.mubr.msk.bf16.mxu0 %vm368_vm1, %v1299_v5  ;;  %v1307_v9 = vld [vmem:[%s1379_s29 + $0x40] sm:$0xff]   ;;  %v1308_v10 = vld [vmem:[%s1379_s29 + $0x48] sm:$0xff]   ;;  %v1309_v11 = vld [vmem:[%s1379_s29 + $0x50] sm:$0xff]   ;;  %s211_s14 = scalar_lea.vmem %s1526_s4, %s1011_s11 }
  0x10   : > { %1258 = vmatprep.mubr.msk.bf16.mxu1 %vm368_vm1, %v1307_v9  ;;  %v1302_v12 = vld [vmem:[%s1379_s29 + $0x18] sm:$0xff]   ;;  %v1303_v14 = vld [vmem:[%s1379_s29 + $0x20] sm:$0xff]   ;;  %v1304_v16 = vld [vmem:[%s1379_s29 + $0x28] sm:$0xff]  }
  0x11   : > { %1235 = vmatpush3.bf16.msra.mxu0 %v1295_v1  ;;  %1280 = vmatpush3.bf16.msra.mxu1 %v1295_v1  ;;  %v1310_v13 = vld [vmem:[%s1379_s29 + $0x58] sm:$0xff]   ;;  %v1311_v15 = vld [vmem:[%s1379_s29 + $0x60] sm:$0xff]   ;;  %v1312_v17 = vld [vmem:[%s1379_s29 + $0x68] sm:$0xff]  }
  0x12   : > { %1236 = vmatprep.subr.bf16.mxu0 %v1296_v3  ;;  %1276 = vmatprep.subr.bf16.mxu1 %v1296_v3  ;;  %v1305_v18 = vld [vmem:[%s1379_s29 + $0x30] sm:$0xff]   ;;  %v1306_v20 = vld [vmem:[%s1379_s29 + $0x38] sm:$0xff]  }
  0x13   : > { %v1313_v19 = vld [vmem:[%s1379_s29 + $0x70] sm:$0xff]   ;;  %v1314_v21 = vld [vmem:[%s1379_s29 + $0x78] sm:$0xff]  }
  0x15   : > { %1237 = vmatpush3.bf16.msra.mxu0 %v1296_v3  ;;  %1281 = vmatpush3.bf16.msra.mxu1 %v1296_v3 }
  0x16   : > { %1238 = vmatprep.subr.bf16.mxu0 %v1297_v4  ;;  %1277 = vmatprep.subr.bf16.mxu1 %v1297_v4 }
  0x19   : > { %1239 = vmatpush3.bf16.msra.mxu0 %v1297_v4  ;;  %1282 = vmatpush3.bf16.msra.mxu1 %v1297_v4 }
  0x1a   : > { %1240 = vmatprep.subr.bf16.mxu0 %v1298_v6  ;;  %1278 = vmatprep.subr.bf16.mxu1 %v1298_v6 }
  0x1d   : > { %1241 = vmatpush3.bf16.msra.mxu0 %v1298_v6  ;;  %1283 = vmatpush3.bf16.msra.mxu1 %v1298_v6 }
  0x20   : > { %1243 = vmatmul.mubr.msk.bf16.vlgmr.msra.gmra.mxu0 %vm368_vm1, %v1300_v7  ;;  %1259 = vmatmul.mubr.msk.bf16.vlgmr.msra.gmra.mxu1 %vm368_vm1, %v1308_v10 }
  0x21   : > { %1246 = vmatprep.mubr.msk.bf16.mxu0 %vm368_vm1, %v1301_v8  ;;  %1262 = vmatprep.mubr.msk.bf16.mxu1 %vm368_vm1, %v1309_v11 }
  0x28   : > { %1247 = vmatmul.mubr.msk.bf16.gmra.mxu0 %vm368_vm1, %v1302_v12  ;;  %1263 = vmatmul.mubr.msk.bf16.gmra.mxu1 %vm368_vm1, %v1310_v13 }
  0x29   : > { %1250 = vmatprep.mubr.msk.bf16.mxu0 %vm368_vm1, %v1303_v14  ;;  %1266 = vmatprep.mubr.msk.bf16.mxu1 %vm368_vm1, %v1311_v15 }
  0x30   : > { %1251 = vmatmul.mubr.msk.bf16.gmra.mxu0 %vm368_vm1, %v1304_v16  ;;  %1267 = vmatmul.mubr.msk.bf16.gmra.mxu1 %vm368_vm1, %v1312_v17 }
  0x31   : > { %1254 = vmatprep.mubr.msk.bf16.mxu0 %vm368_vm1, %v1305_v18  ;;  %1270 = vmatprep.mubr.msk.bf16.mxu1 %vm368_vm1, %v1313_v19 }
  0x38   : > { %1255 = vmatmul.mubr.msk.bf16.gmra.mxu0 %vm368_vm1, %v1306_v20  ;;  %1271 = vmatmul.mubr.msk.bf16.gmra.mxu1 %vm368_vm1, %v1314_v21 }
  0xe0   : > { %v1244_v23 = vpop.f32.mrf.mxu0  ;;  %v1260_v24 = vpop.f32.mrf.mxu1 }
  0xe1   : > { %v528_v25 = vadd.f32 %v1260_v24, %v1419_v22  ;;  %v464_v26 = vadd.f32 %v1244_v23, %v1419_v22 }
  0xe2   : > { %v455_v27 = vpop.f32.mrf.mxu0  ;;  %v519_v28 = vpop.f32.mrf.mxu1 }
  0xe3   : > { %v520_v30 = vadd.f32 %v1419_v22, %v519_v28  ;;  %v456_v32 = vadd.f32 %v1419_v22, %v455_v27  ;;  %v600_v34 = vmax.f32 %v528_v25, 0.0  ;;  %v584_v36 = vmax.f32 %v464_v26, 0.0 }
  0xe4   : > { %v1245_v29 = vpop.f32.mrf.mxu0  ;;  %v1261_v31 = vpop.f32.mrf.mxu1 }
  0xe5   : > { %v467_v33 = vadd.f32 %v1245_v29, %v1419_v22  ;;  %v531_v35 = vadd.f32 %v1261_v31, %v1419_v22  ;;  %v598_v44 = vmax.f32 %v520_v30, 0.0  ;;  %v582_v46 = vmax.f32 %v456_v32, 0.0 }
  0xe6   : > { %v458_v37 = vpop.f32.mrf.mxu0  ;;  %v522_v38 = vpop.f32.mrf.mxu1 }
  0xe7   : > { %v585_v39 = vmax.f32 %v467_v33, 0.0  ;;  %v459_v40 = vadd.f32 %v1419_v22, %v458_v37  ;;  %v601_v41 = vmax.f32 %v531_v35, 0.0  ;;  %v523_v42 = vadd.f32 %v1419_v22, %v522_v38 }
  0xe8   : > { %v1248_v43 = vpop.f32.mrf.mxu0  ;;  %v1264_v45 = vpop.f32.mrf.mxu1 }
  0xe9   : > { %v615_v47 = vpack.c.bf16 %v585_v39, %v584_v36  ;;  %v583_v48 = vmax.f32 %v459_v40, 0.0  ;;  %v1436_v49 = vpack.c.bf16 %v601_v41, %v600_v34  ;;  %v599_v51 = vmax.f32 %v523_v42, 0.0 }
  0xea   : > { %v471_v50 = vpop.f32.mrf.mxu0  ;;  %v535_v52 = vpop.f32.mrf.mxu1  ;;  %v480_v55 = vadd.f32 %v1248_v43, %v1419_v22  ;;  %v544_v0 = vadd.f32 %v1264_v45, %v1419_v22 }
  0xeb   : > { %1196 = vst [vmem:[%s1434_s10 + $0x8] sm:$0xff] %v615_v47   ;;  %v614_v53 = vpack.c.bf16 %v583_v48, %v582_v46  ;;  %1204 = vst [vmem:[%s1434_s10 + $0x48] sm:$0xff] %v1436_v49   ;;  %v776_v54 = vunpack.c.l.bf16 %v615_v47  ;;  %v1442_v57 = vpack.c.bf16 %v599_v51, %v598_v44  ;;  %v472_v61 = vadd.f32 %v1419_v22, %v471_v50 }
  0xec   : > { %v1249_v56 = vpop.f32.mrf.mxu0  ;;  %v1265_v58 = vpop.f32.mrf.mxu1  ;;  %v777_v6 = vunpack.c.h.bf16 %v615_v47  ;;  %v588_v8 = vmax.f32 %v480_v55, 0.0  ;;  %v604_v25 = vmax.f32 %v544_v0, 0.0  ;;  %v1458_v26 = vadd.f32 %v1419_v22, %v535_v52 }
  0xed   : > { %1120 = vst [vmem:[%s1434_s10] sm:$0xff] %v614_v53   ;;  %v774_v59 = vunpack.c.l.bf16 %v614_v53  ;;  %v775_v60 = vunpack.c.h.bf16 %v614_v53  ;;  %v483_v62 = vadd.f32 %v1249_v56, %v1419_v22  ;;  %1203 = vst [vmem:[%s1434_s10 + $0x40] sm:$0xff] %v1442_v57   ;;  %v845_v7 = vmul.f32 %v776_v54, %v776_v54 }
  0xee   : > { %v474_v63 = vpop.f32.mrf.mxu0  ;;  %v538_v1 = vpop.f32.mrf.mxu1  ;;  %v586_v14 = vmax.f32 %v472_v61, 0.0  ;;  %v846_v23 = vmul.f32 %v777_v6, %v777_v6  ;;  %v547_v36 = vadd.f32 %v1265_v58, %v1419_v22 }
  0xef   : > { %v806_v2 = vadd.f32 %v775_v60, %v774_v59  ;;  %v843_v3 = vmul.f32 %v774_v59, %v774_v59  ;;  %v844_v4 = vmul.f32 %v775_v60, %v775_v60  ;;  %v475_v5 = vadd.f32 %v1419_v22, %v474_v63 }
  0xf0   : > { %v589_v9 = vmax.f32 %v483_v62, 0.0  ;;  %v1252_v10 = vpop.f32.mrf.mxu0  ;;  %v1451_v11 = vpop.f32.mrf.mxu1  ;;  %v605_v46 = vmax.f32 %v547_v36, 0.0  ;;  %v539_v51 = vadd.f32 %v1419_v22, %v538_v1 }
  0xf1   : > { %v807_v12 = vadd.f32 %v806_v2, %v776_v54  ;;  %v875_v13 = vadd.f32 %v844_v4, %v843_v3  ;;  %v587_v15 = vmax.f32 %v475_v5, 0.0  ;;  %v496_v17 = vadd.f32 %v1252_v10, %v1419_v22 }
  0xf2   : > { %v617_v16 = vpack.c.bf16 %v589_v9, %v588_v8  ;;  %v487_v18 = vpop.f32.mrf.mxu0  ;;  %v1454_v19 = vpop.f32.mrf.mxu1  ;;  %v1470_v55 = vpack.c.bf16 %v605_v46, %v604_v25  ;;  %v602_v2 = vmax.f32 %v1458_v26, 0.0  ;;  %v603_v5 = vmax.f32 %v539_v51, 0.0 }
  0xf3   : > { %v876_v20 = vadd.f32 %v875_v13, %v845_v7  ;;  %v616_v21 = vpack.c.bf16 %v587_v15, %v586_v14  ;;  %v808_v30 = vadd.f32 %v807_v12, %v777_v6  ;;  %v592_v33 = vmax.f32 %v496_v17, 0.0 }
  0xf4   : > { %1198 = vst [vmem:[%s1434_s10 + $0x18] sm:$0xff] %v617_v16   ;;  %v1253_v24 = vpop.f32.mrf.mxu0  ;;  %v1460_v27 = vpop.f32.mrf.mxu1  ;;  %v780_v32 = vunpack.c.l.bf16 %v617_v16  ;;  %v488_v34 = vadd.f32 %v1419_v22, %v487_v18  ;;  %v781_v42 = vunpack.c.h.bf16 %v617_v16  ;;  %1206 = vst [vmem:[%s1434_s10 + $0x58] sm:$0xff] %v1470_v55   ;;  %v560_v10 = vadd.f32 %v1451_v11, %v1419_v22 }
  0xf5   : > { %1197 = vst [vmem:[%s1434_s10 + $0x10] sm:$0xff] %v616_v21   ;;  %v778_v28 = vunpack.c.l.bf16 %v616_v21  ;;  %v779_v29 = vunpack.c.h.bf16 %v616_v21  ;;  %v499_v31 = vadd.f32 %v1253_v24, %v1419_v22  ;;  %v877_v40 = vadd.f32 %v876_v20, %v846_v23 }
  0xf6   : > { %v490_v35 = vpop.f32.mrf.mxu0  ;;  %v1466_v37 = vpop.f32.mrf.mxu1  ;;  %v590_v52 = vmax.f32 %v488_v34, 0.0  ;;  %v849_v58 = vmul.f32 %v780_v32, %v780_v32  ;;  %v850_v61 = vmul.f32 %v781_v42, %v781_v42  ;;  %v1485_v25 = vpack.c.bf16 %v603_v5, %v602_v2 }
  0xf7   : > { %v809_v38 = vadd.f32 %v808_v30, %v778_v28  ;;  %v847_v39 = vmul.f32 %v778_v28, %v778_v28  ;;  %v593_v41 = vmax.f32 %v499_v31, 0.0  ;;  %v848_v43 = vmul.f32 %v779_v29, %v779_v29 }
  0xf8   : > { %v491_v44 = vadd.f32 %v1419_v22, %v490_v35  ;;  %v1256_v45 = vpop.f32.mrf.mxu0  ;;  %v1472_v56 = vpop.f32.mrf.mxu1  ;;  %v552_v11 = vadd.f32 %v1419_v22, %v1454_v19  ;;  %1205 = vst [vmem:[%s1434_s10 + $0x50] sm:$0xff] %v1485_v25  }
  0xf9   : > { %v810_v47 = vadd.f32 %v809_v38, %v779_v29  ;;  %v878_v48 = vadd.f32 %v877_v40, %v847_v39  ;;  %v619_v50 = vpack.c.bf16 %v593_v41, %v592_v33  ;;  %v512_v63 = vadd.f32 %v1256_v45, %v1419_v22 }
  0xfa   : > { %v591_v53 = vmax.f32 %v491_v44, 0.0  ;;  %v503_v54 = vpop.f32.mrf.mxu0  ;;  %v567_v12 = vpop.f32.mrf.mxu1  ;;  %v563_v33 = vadd.f32 %v1460_v27, %v1419_v22  ;;  %v608_v38 = vmax.f32 %v560_v10, 0.0  ;;  %v606_v41 = vmax.f32 %v552_v11, 0.0 }
  0xfb   : > { %v811_v59 = vadd.f32 %v810_v47, %v780_v32  ;;  %v879_v60 = vadd.f32 %v878_v48, %v848_v43  ;;  %1200 = vst [vmem:[%s1434_s10 + $0x28] sm:$0xff] %v619_v50   ;;  %v504_v4 = vadd.f32 %v1419_v22, %v503_v54  ;;  %v784_v13 = vunpack.c.l.bf16 %v619_v50 }
  0xfc   : > { %v618_v62 = vpack.c.bf16 %v591_v53, %v590_v52  ;;  %v1257_v0 = vpop.f32.mrf.mxu0  ;;  %v785_v14 = vunpack.c.h.bf16 %v619_v50  ;;  %v596_v20 = vmax.f32 %v512_v63, 0.0  ;;  %v1273_v31 = vpop.f32.mrf.mxu1  ;;  %v609_v50 = vmax.f32 %v563_v33, 0.0 }
  0xfd   : > { %v880_v1 = vadd.f32 %v879_v60, %v849_v58  ;;  %v812_v3 = vadd.f32 %v811_v59, %v781_v42  ;;  %v515_v8 = vadd.f32 %v1257_v0, %v1419_v22  ;;  %v594_v23 = vmax.f32 %v504_v4, 0.0 }
  0xfe   : > { %1199 = vst [vmem:[%s1434_s10 + $0x20] sm:$0xff] %v618_v62   ;;  %v782_v6 = vunpack.c.l.bf16 %v618_v62  ;;  %v783_v7 = vunpack.c.h.bf16 %v618_v62  ;;  %v506_v9 = vpop.f32.mrf.mxu0  ;;  %v853_v34 = vmul.f32 %v784_v13, %v784_v13  ;;  %v854_v39 = vmul.f32 %v785_v14, %v785_v14  ;;  %v570_v46 = vpop.f32.mrf.mxu1 }
  0xff   : > { %v881_v15 = vadd.f32 %v880_v1, %v850_v61  ;;  %v507_v16 = vadd.f32 %v1419_v22, %v506_v9  ;;  %v597_v21 = vmax.f32 %v515_v8, 0.0  ;;  %v555_v27 = vadd.f32 %v1419_v22, %v1466_v37 }
 0x100   : > { %v813_v17 = vadd.f32 %v812_v3, %v782_v6  ;;  %v851_v18 = vmul.f32 %v782_v6, %v782_v6  ;;  %v852_v28 = vmul.f32 %v783_v7, %v783_v7  ;;  %v576_v53 = vadd.f32 %v1472_v56, %v1419_v22 }
 0x101   : > { %v595_v24 = vmax.f32 %v507_v16, 0.0  ;;  %v621_v30 = vpack.c.bf16 %v597_v21, %v596_v20  ;;  %v568_v54 = vadd.f32 %v1419_v22, %v567_v12  ;;  %v627_v58 = vpack.c.bf16 %v609_v50, %v608_v38 }
 0x102   : > { %v814_v26 = vadd.f32 %v813_v17, %v783_v7  ;;  %v882_v29 = vadd.f32 %v881_v15, %v851_v18  ;;  %v607_v59 = vmax.f32 %v555_v27, 0.0  ;;  %v579_v60 = vadd.f32 %v1273_v31, %v1419_v22 }
 0x103   : > { %v620_v32 = vpack.c.bf16 %v595_v24, %v594_v23  ;;  %1202 = vst [vmem:[%s1434_s10 + $0x38] sm:$0xff] %v621_v30   ;;  %v788_v43 = vunpack.c.l.bf16 %v621_v30  ;;  %v789_v44 = vunpack.c.h.bf16 %v621_v30  ;;  %v571_v61 = vadd.f32 %v1419_v22, %v570_v46  ;;  %1208 = vst [vmem:[%s1434_s10 + $0x68] sm:$0xff] %v627_v58  }
 0x104   : > { %v815_v35 = vadd.f32 %v814_v26, %v784_v13  ;;  %v883_v36 = vadd.f32 %v882_v29, %v852_v28  ;;  %v612_v0 = vmax.f32 %v576_v53, 0.0  ;;  %v610_v2 = vmax.f32 %v568_v54, 0.0 }
 0x105   : > { %1201 = vst [vmem:[%s1434_s10 + $0x30] sm:$0xff] %v620_v32   ;;  %v786_v40 = vunpack.c.l.bf16 %v620_v32  ;;  %v787_v19 = vunpack.c.h.bf16 %v620_v32  ;;  %v790_v37 = vunpack.c.l.bf16 %v1442_v57  ;;  %v626_v1 = vpack.c.bf16 %v607_v59, %v606_v41 }
 0x106   : > { %v884_v42 = vadd.f32 %v883_v36, %v853_v34  ;;  %v816_v45 = vadd.f32 %v815_v35, %v785_v14  ;;  %v613_v3 = vmax.f32 %v579_v60, 0.0  ;;  %v857_v56 = vmul.f32 %v788_v43, %v788_v43 }
 0x107   : > { %v855_v47 = vmul.f32 %v786_v40, %v786_v40  ;;  %v856_v48 = vmul.f32 %v787_v19, %v787_v19  ;;  %v611_v6 = vmax.f32 %v571_v61, 0.0  ;;  %v858_v7 = vmul.f32 %v789_v44, %v789_v44  ;;  %1207 = vst [vmem:[%s1434_s10 + $0x60] sm:$0xff] %v626_v1  }
 0x108   : > { %v817_v51 = vadd.f32 %v816_v45, %v786_v40  ;;  %v885_v52 = vadd.f32 %v884_v42, %v854_v39  ;;  %v791_v8 = vunpack.c.h.bf16 %v1442_v57  ;;  %v629_v10 = vpack.c.bf16 %v613_v3, %v612_v0 }
 0x109   : > { %v628_v12 = vpack.c.bf16 %v611_v6, %v610_v2  ;;  %v792_v13 = vunpack.c.l.bf16 %v1436_v49  ;;  %v859_v15 = vmul.f32 %v790_v37, %v790_v37  ;;  %v793_v17 = vunpack.c.h.bf16 %v1436_v49 }
 0x10a   : > { %v818_v62 = vadd.f32 %v817_v51, %v787_v19  ;;  %v886_v63 = vadd.f32 %v885_v52, %v855_v47  ;;  %1210 = vst [vmem:[%s1434_s10 + $0x78] sm:$0xff] %v629_v10   ;;  %v860_v20 = vmul.f32 %v791_v8, %v791_v8  ;;  %v794_v11 = vunpack.c.l.bf16 %v1485_v25 }
 0x10b   : > { %1209 = vst [vmem:[%s1434_s10 + $0x70] sm:$0xff] %v628_v12   ;;  %v861_v23 = vmul.f32 %v792_v13, %v792_v13  ;;  %v862_v26 = vmul.f32 %v793_v17, %v793_v17  ;;  %v795_v29 = vunpack.c.h.bf16 %v1485_v25  ;;  %v796_v31 = vunpack.c.l.bf16 %v1470_v55 }
 0x10c   : > { %v819_v4 = vadd.f32 %v818_v62, %v788_v43  ;;  %v887_v5 = vadd.f32 %v886_v63, %v856_v48  ;;  %v863_v33 = vmul.f32 %v794_v11, %v794_v11  ;;  %v797_v49 = vunpack.c.h.bf16 %v1470_v55 }
 0x10d   : > { %v864_v36 = vmul.f32 %v795_v29, %v795_v29  ;;  %v865_v39 = vmul.f32 %v796_v31, %v796_v31  ;;  %v798_v41 = vunpack.c.l.bf16 %v626_v1  ;;  %v800_v25 = vunpack.c.l.bf16 %v627_v58 }
 0x10e   : > { %v888_v22 = vadd.f32 %v887_v5, %v857_v56  ;;  %v820_v9 = vadd.f32 %v819_v4, %v789_v44  ;;  %v866_v42 = vmul.f32 %v797_v49, %v797_v49  ;;  %v799_v44 = vunpack.c.h.bf16 %v626_v1 }
 0x10f   : > { %v867_v47 = vmul.f32 %v798_v41, %v798_v41  ;;  %v801_v50 = vunpack.c.h.bf16 %v627_v58  ;;  %v869_v55 = vmul.f32 %v800_v25, %v800_v25  ;;  %v802_v59 = vunpack.c.l.bf16 %v628_v12 }
 0x110   : > { %v821_v14 = vadd.f32 %v820_v9, %v790_v37  ;;  %v889_v16 = vadd.f32 %v888_v22, %v858_v7  ;;  %v868_v51 = vmul.f32 %v799_v44, %v799_v44  ;;  %v803_v62 = vunpack.c.h.bf16 %v628_v12 }
 0x111   : > { %v870_v60 = vmul.f32 %v801_v50, %v801_v50  ;;  %v804_v0 = vunpack.c.l.bf16 %v629_v10  ;;  %v871_v37 = vmul.f32 %v802_v59, %v802_v59  ;;  %v805_v3 = vunpack.c.h.bf16 %v629_v10 }
 0x112   : > { %v822_v18 = vadd.f32 %v821_v14, %v791_v8  ;;  %v890_v21 = vadd.f32 %v889_v16, %v859_v15  ;;  %v872_v58 = vmul.f32 %v803_v62, %v803_v62 }
 0x113   : > { %v873_v5 = vmul.f32 %v804_v0, %v804_v0  ;;  %v874_v8 = vmul.f32 %v805_v3, %v805_v3 }
 0x114   : > { %v823_v24 = vadd.f32 %v822_v18, %v792_v13  ;;  %v891_v57 = vadd.f32 %v890_v21, %v860_v20 }
 0x116   : > { %v892_v28 = vadd.f32 %v891_v57, %v861_v23  ;;  %v824_v30 = vadd.f32 %v823_v24, %v793_v17 }
 0x118   : > { %v825_v32 = vadd.f32 %v824_v30, %v794_v11  ;;  %v893_v34 = vadd.f32 %v892_v28, %v862_v26 }
 0x11a   : > { %v826_v35 = vadd.f32 %v825_v32, %v795_v29  ;;  %v894_v38 = vadd.f32 %v893_v34, %v863_v33 }
 0x11c   : > { %v827_v40 = vadd.f32 %v826_v35, %v796_v31  ;;  %v895_v19 = vadd.f32 %v894_v38, %v864_v36 }
 0x11e   : > { %v896_v43 = vadd.f32 %v895_v19, %v865_v39  ;;  %v828_v45 = vadd.f32 %v827_v40, %v797_v49 }
 0x120   : > { %v829_v46 = vadd.f32 %v828_v45, %v798_v41  ;;  %v897_v48 = vadd.f32 %v896_v43, %v866_v42 }
 0x122   : > { %v830_v27 = vadd.f32 %v829_v46, %v799_v44  ;;  %v898_v52 = vadd.f32 %v897_v48, %v867_v47 }
 0x124   : > { %v831_v53 = vadd.f32 %v830_v27, %v800_v25  ;;  %v899_v54 = vadd.f32 %v898_v52, %v868_v51 }
 0x126   : > { %v900_v61 = vadd.f32 %v899_v54, %v869_v55  ;;  %v832_v63 = vadd.f32 %v831_v53, %v801_v50 }
 0x128   : > { %v833_v2 = vadd.f32 %v832_v63, %v802_v59  ;;  %v901_v1 = vadd.f32 %v900_v61, %v870_v60 }
 0x12a   : > { %v834_v56 = vadd.f32 %v833_v2, %v803_v62  ;;  %v902_v4 = vadd.f32 %v901_v1, %v871_v37 }
 0x12c   : > { %v835_v6 = vadd.f32 %v834_v56, %v804_v0  ;;  %v903_v7 = vadd.f32 %v902_v4, %v872_v58 }
 0x12e   : > { %v836_v22 = vadd.f32 %v835_v6, %v805_v3  ;;  %v904_v9 = vadd.f32 %v903_v7, %v873_v5 }
 0x130   : > { %v837_v13 = vrot.slane %v836_v22, 4  ;;  %v905_v14 = vadd.f32 %v904_v9, %v874_v8 }
 0x132   : > { %v838_v12 = vadd.f32 %v837_v13, %v836_v22  ;;  %v906_v15 = vrot.slane %v905_v14, 4 }
 0x134   : > { %v839_v16 = vrot.slane %v838_v12, 2  ;;  %v907_v17 = vadd.f32 %v906_v15, %v905_v14 }
 0x136   : > { %v840_v18 = vadd.f32 %v839_v16, %v838_v12  ;;  %v908_v10 = vrot.slane %v907_v17, 2 }
 0x138   : > { %v841_v20 = vrot.slane %v840_v18, 1  ;;  %v909_v21 = vadd.f32 %v908_v10, %v907_v17 }
 0x13a   : > { %v910_v23 = vrot.slane %v909_v21, 1  ;;  %v842_v24 = vadd.f32 %v841_v20, %v840_v18 }
 0x13c   : > { %v911_v57 = vadd.f32 %v910_v23, %v909_v21 }
 0x13e   : > { %v913_v11 = vsel %vm912_vm2, %v842_v24, %v911_v57 }
 0x13f   : > { %914 = vst [vmem:[%s211_s14] sm:$0x3] %v913_v11 }
 0x140 PF: > { %s15_s15 = sadd.s32 1, %s1321_s15  }
 0x141   : > { %p12_p5 = scmp.ge.s32.totalorder %s15_s15, 4  }
 0x143   :  { %14 = sbr.rel (!%p12_p5) target bundleno = 1 (0x1), region = 74 }

// kernel: block_forward.11
= control target key start
LH: loop header
LB: loop body
LE: loop exit
PB: predicated region body
PF: predicated region fallthrough
CT: control target
= control target key end

     0   :  { %s531_s12 = smov 0   ;;  %s585_s0 = inlined_call_operand.vmem [shape: bf16[128,128], index: 0, kind: input, shape index: {}]   ;;  %s586_s1 = inlined_call_operand.vmem [shape: bf16[128,128], index: 1, kind: input, shape index: {}]   ;;  %s587_s2 = inlined_call_operand.vmem [shape: f32[1,128], index: 2, kind: input, shape index: {}]   ;;  %s588_s3 = inlined_call_operand.vmem [shape: f32[128,128], index: 3, kind: output, shape index: {}]  }
   0x1 LB: > { %s407_s13 = sadd.s32 4294967295, %s509_s12   ;;  %p411_p0 = scmp.ge.s32.totalorder %s509_s12, 1  ;;  %s509_s12 = sphi %s531_s12, %s13_s12  }
   0x2   : > { %p138_p1 = scmp.lt.s32.totalorder %s509_s12, 3 }
   0x4   : > { %p139_p2 = pnand %p411_p0, %p138_p1 }
   0x5   : > { %s412_s16 = sshll.u32 (!%p139_p2), %s407_s13, 3 }
   0x6   : > { %142 = sbr.rel (%p139_p2) target bundleno = 246 (0xf6), region = 32  ;;  %p163_p3 = scmp.lt.s32.totalorder (!%p139_p2), %s412_s16, 15 }
   0xb   : > { %v491_v0 = vld [vmem:[%s586_s1 + $0x38] sm:$0xff]   ;;  %v492_v1 = vld [vmem:[%s586_s1 + $0x30] sm:$0xff]   ;;  %s590_s16 = smov (!%p163_p3, %s412_s16), 15  ;;  %v493_v2 = vld [vmem:[%s586_s1 + $0x28] sm:$0xff]  }
   0xc   : > { %443 = vmatprep.subr.bf16.mxu0 %v491_v0  ;;  %467 = vmatprep.subr.bf16.mxu1 %v491_v0  ;;  %s413_s21 = sshll.u32 %s590_s16, 2  ;;  %v494_v3 = vld [vmem:[%s586_s1 + $0x20] sm:$0xff]   ;;  %v495_v6 = vld [vmem:[%s586_s1 + $0x18] sm:$0xff]   ;;  %v496_v7 = vld [vmem:[%s586_s1 + $0x10] sm:$0xff]   ;;  %s415_s8 = sshll.u32 %s590_s16, 3 }
   0xd   : > { %444 = vmatpush3.bf16.msra.mxu0 %v491_v0  ;;  %475 = vmatpush3.bf16.msra.mxu1 %v491_v0  ;;  %s554_s24 = scalar_lea.vmem %s585_s0, %s413_s21  ;;  %v497_v8 = vld [vmem:[%s586_s1 + $0x8] sm:$0xff]   ;;  %v498_v9 = vld [vmem:[%s586_s1] sm:$0xff]   ;;  %s172_s14 = scalar_lea.vmem %s588_s3, %s415_s8 }
   0xe   : > { %445 = vmatprep.subr.bf16.mxu0 %v492_v1  ;;  %468 = vmatprep.subr.bf16.mxu1 %v492_v1  ;;  %v499_v4 = vld [vmem:[%s554_s24] sm:$0xff]   ;;  %v500_v5 = vld [vmem:[%s554_s24 + $0x10] sm:$0xff]   ;;  %v501_v10 = vld [vmem:[%s554_s24 + $0x8] sm:$0xff]  }
   0xf   : > { %459 = vmatprep.mubr.bf16.mxu0 %v499_v4  ;;  %463 = vmatprep.mubr.bf16.mxu1 %v500_v5  ;;  %v502_v11 = vld [vmem:[%s554_s24 + $0x18] sm:$0xff]   ;;  %v416_v12 = vld [vmem:[%s587_s2] ss:$0 sm:$0xff] }
  0x11   : > { %446 = vmatpush3.bf16.msra.mxu0 %v492_v1  ;;  %476 = vmatpush3.bf16.msra.mxu1 %v492_v1 }
  0x12   : > { %447 = vmatprep.subr.bf16.mxu0 %v493_v2  ;;  %469 = vmatprep.subr.bf16.mxu1 %v493_v2 }
  0x15   : > { %448 = vmatpush3.bf16.msra.mxu0 %v493_v2  ;;  %477 = vmatpush3.bf16.msra.mxu1 %v493_v2 }
  0x16   : > { %449 = vmatprep.subr.bf16.mxu0 %v494_v3  ;;  %470 = vmatprep.subr.bf16.mxu1 %v494_v3 }
  0x19   : > { %450 = vmatpush3.bf16.msra.mxu0 %v494_v3  ;;  %478 = vmatpush3.bf16.msra.mxu1 %v494_v3 }
  0x1a   : > { %451 = vmatprep.subr.bf16.mxu0 %v495_v6  ;;  %471 = vmatprep.subr.bf16.mxu1 %v495_v6 }
  0x1d   : > { %452 = vmatpush3.bf16.msra.mxu0 %v495_v6  ;;  %479 = vmatpush3.bf16.msra.mxu1 %v495_v6 }
  0x1e   : > { %453 = vmatprep.subr.bf16.mxu0 %v496_v7  ;;  %472 = vmatprep.subr.bf16.mxu1 %v496_v7 }
  0x21   : > { %454 = vmatpush3.bf16.msra.mxu0 %v496_v7  ;;  %480 = vmatpush3.bf16.msra.mxu1 %v496_v7 }
  0x22   : > { %455 = vmatprep.subr.bf16.mxu0 %v497_v8  ;;  %473 = vmatprep.subr.bf16.mxu1 %v497_v8 }
  0x25   : > { %456 = vmatpush3.bf16.msra.mxu0 %v497_v8  ;;  %481 = vmatpush3.bf16.msra.mxu1 %v497_v8 }
  0x26   : > { %457 = vmatprep.subr.bf16.mxu0 %v498_v9  ;;  %474 = vmatprep.subr.bf16.mxu1 %v498_v9 }
  0x29   : > { %458 = vmatpush3.bf16.msra.mxu0 %v498_v9  ;;  %482 = vmatpush3.bf16.msra.mxu1 %v498_v9 }
  0x2c   : > { %460 = vmatmul.mubr.bf16.vlgmr.msra.gmra.mxu0 %v501_v10  ;;  %464 = vmatmul.mubr.bf16.vlgmr.msra.gmra.mxu1 %v502_v11 }
  0xec   : > { %v461_v13 = vpop.f32.mrf.mxu0  ;;  %v465_v14 = vpop.f32.mrf.mxu1 }
  0xed   : > { %v321_v15 = vadd.f32 %v461_v13, %v416_v12  ;;  %v337_v16 = vadd.f32 %v465_v14, %v416_v12 }
  0xee   : > { %v312_v17 = vpop.f32.mrf.mxu0  ;;  %v328_v18 = vpop.f32.mrf.mxu1 }
  0xef   : > { %345 = vst [vmem:[%s172_s14 + $0x10] sm:$0xff] %v321_v15  ;;  %349 = vst [vmem:[%s172_s14 + $0x30] sm:$0xff] %v337_v16  ;;  %v313_v19 = vadd.f32 %v416_v12, %v312_v17  ;;  %v329_v20 = vadd.f32 %v416_v12, %v328_v18 }
  0xf0   : > { %v462_v21 = vpop.f32.mrf.mxu0  ;;  %v466_v22 = vpop.f32.mrf.mxu1 }
  0xf1   : > { %343 = vst [vmem:[%s172_s14] sm:$0xff] %v313_v19  ;;  %347 = vst [vmem:[%s172_s14 + $0x20] sm:$0xff] %v329_v20  ;;  %v324_v23 = vadd.f32 %v462_v21, %v416_v12  ;;  %v340_v24 = vadd.f32 %v466_v22, %v416_v12 }
  0xf2   : > { %v315_v25 = vpop.f32.mrf.mxu0  ;;  %v331_v26 = vpop.f32.mrf.mxu1 }
  0xf3   : > { %346 = vst [vmem:[%s172_s14 + $0x18] sm:$0xff] %v324_v23  ;;  %350 = vst [vmem:[%s172_s14 + $0x38] sm:$0xff] %v340_v24  ;;  %v316_v27 = vadd.f32 %v416_v12, %v315_v25  ;;  %v332_v28 = vadd.f32 %v416_v12, %v331_v26 }
  0xf5   : > { %344 = vst [vmem:[%s172_s14 + $0x8] sm:$0xff] %v316_v27  ;;  %348 = vst [vmem:[%s172_s14 + $0x28] sm:$0xff] %v332_v28 }
  0xf6 PF: > { %s13_s12 = sadd.s32 1, %s509_s12  }
  0xf7   : > { %p10_p4 = scmp.ge.s32.totalorder %s13_s12, 4  }
  0xf9   :  { %12 = sbr.rel (!%p10_p4) target bundleno = 1 (0x1), region = 62 }

</bundles_post_ra>
